<compile_context>
chip_gen: v7x
topology: tpu7x:2x2x1
jax: 0.10.0
libtpu: 0.0.40
codegen_flags: <defaults>
</compile_context>

<pallas_src>
import functools

import jax
import jax.numpy as jnp
from jax import lax
from jax.experimental import pallas as pl
from jax.experimental.pallas import tpu as pltpu


# ---------------------------------------------------------------------------
# Fused kernel: per-meta-path GCNConv + online semantic-attention softmax.
# grid = (N // TILE_R, M)  -- row tiles "parallel", meta-paths "arbitrary" (reduction).
# ---------------------------------------------------------------------------
def _hgcn_fused_kernel(adj_ref, dis_ref, xws_ref, b_ref, w1_ref, b1_ref, w2_ref,
                       out_ref, m_sc, l_sc, acc_sc):
    m_idx = pl.program_id(1)

    @pl.when(m_idx == 0)
    def _init():
        m_sc[...] = jnp.full_like(m_sc, -jnp.inf)
        l_sc[...] = jnp.zeros_like(l_sc)
        acc_sc[...] = jnp.zeros_like(acc_sc)

    tile_r = adj_ref.shape[1]
    row0 = pl.multiple_of(pl.program_id(0) * tile_r, tile_r)

    # int8 {0,1} adjacency row slab -> bf16 for the MXU (exact; via f32 for safe lowering).
    adj_bf = adj_ref[0].astype(jnp.float32).astype(jnp.bfloat16)            # [TILE_R, N]

    dis_r = dis_ref[0]                                                      # [TILE_R, 1]
    xws_m = xws_ref[m_idx]                                                  # [N, Fp] bf16
    xws_tile = xws_ref[m_idx, pl.ds(row0, tile_r), :].astype(jnp.float32)   # [TILE_R, Fp]

    # A[tile, :] @ (D^{-1/2} X W_m)  on the MXU (bf16 operands, f32 accumulation).
    aggr = jnp.dot(adj_bf, xws_m, preferred_element_type=jnp.float32)       # [TILE_R, Fp]

    # z_m = D^{-1/2} A D^{-1/2} XW + D^{-1} XW + b_m     (symmetric-A identity)
    z = dis_r * (aggr + xws_tile) + b_ref[m_idx]                            # [TILE_R, Fp]

    # Semantic-attention logit  s_m = tanh(z_m @ W1 + b1) @ w2
    # (second Linear done as VPU multiply + XLU lane reduce).
    p = jnp.tanh(jnp.dot(z, w1_ref[...], preferred_element_type=jnp.float32)
                 + b1_ref[...])                                             # [TILE_R, H]
    s = jnp.sum(p * w2_ref[...], axis=-1, keepdims=True)                    # [TILE_R, 1]

    # Online softmax over the meta-path axis (running max / denom / weighted sum).
    m_new = jnp.maximum(m_sc[...], s)
    alpha = jnp.exp(m_sc[...] - m_new)
    pexp = jnp.exp(s - m_new)
    l_sc[...] = alpha * l_sc[...] + pexp
    acc_sc[...] = alpha * acc_sc[...] + pexp * z
    m_sc[...] = m_new

    @pl.when(m_idx == pl.num_programs(1) - 1)
    def _finalize():
        # Exact reciprocal for the final normalization (runs once per tile, essentially free).
        out_ref[...] = (acc_sc[...] * (1.0 / l_sc[...])).astype(out_ref.dtype)


# ---------------------------------------------------------------------------
# Wrapper: degrees from the int8 adjacency, hoisted D^{-1/2} XW, lane padding,
# row-tiled pallas_call.
# ---------------------------------------------------------------------------
@functools.partial(jax.jit, static_argnames=("tile_r", "vmem_limit_bytes", "adj_buffers"))
def hgcn_layer_forward(h, adjs_i8, gcn_w, gcn_b, attn_w1, attn_b1, attn_w2,
                       *, tile_r=512, vmem_limit_bytes=48 * 1024 * 1024, adj_buffers=2):
    """adjs_i8: [M, N, N] int8 0/1 SYMMETRIC adjacency (no self loops required).

    tile_r: row-tile size. Use larger tiles (>=512) on v5e/v6e (128 MiB VMEM; raise
    vmem_limit_bytes toward ~96 MiB) and size it so 2*adj_buffers*tile_r*N bytes of
    adjacency plus the resident xws/[tile_r, Fp] scratch fit the 48 MiB budget on v7x.
    adj_buffers: pipeline depth for the adjacency stream (3 helps on v5e).
    """
    m, n, _ = adjs_i8.shape
    f_in = h.shape[1]
    f_out = gcn_w.shape[2]
    hid = attn_w1.shape[1]

    tile_r = min(tile_r, n)
    assert n % tile_r == 0, "N must be a multiple of tile_r (pad rows otherwise)"
    assert tile_r % 32 == 0, "tile_r must be a multiple of 32 (int8 sublane packing)"

    # Lane-dense output width (pad F_out up to a multiple of 128).
    f_pad = ((f_out + 127) // 128) * 128
    pad = f_pad - f_out

    # Degrees (with self loop). Single cheap pass over the int8 adjacency; adjacency is
    # assumed symmetric so row degree == column degree.
    deg = jnp.sum(adjs_i8.astype(jnp.float32), axis=2) + 1.0        # [M, N]
    dis = lax.rsqrt(deg)[:, :, None]                                # [M, N, 1]

    # Hoisted per-meta-path projection: D^{-1/2} (h @ W_m), lane-padded, bf16.
    w_p = jnp.pad(gcn_w, ((0, 0), (0, 0), (0, pad)))                # [M, F_in, Fp]
    xws = (dis * jnp.einsum('nf,mfo->mno', h, w_p)).astype(jnp.bfloat16)  # [M, N, Fp]

    b_p = jnp.pad(gcn_b, ((0, 0), (0, 0), (0, pad)))                # [M, 1, Fp]
    w1_p = jnp.pad(attn_w1, ((0, pad), (0, 0)))                     # [Fp, H]
    w2_row = attn_w2.T                                              # [1, H]

    adj_spec_kwargs = {}
    if adj_buffers != 2:
        adj_spec_kwargs = dict(pipeline_mode=pl.Buffered(adj_buffers))
    adj_spec = pl.BlockSpec((1, tile_r, n), lambda r, mp: (mp, r, 0), **adj_spec_kwargs)

    out_pad = pl.pallas_call(
        _hgcn_fused_kernel,
        out_shape=jax.ShapeDtypeStruct((n, f_pad), jnp.float32),
        grid=(n // tile_r, m),
        in_specs=[
            adj_spec,                                                # adjacency slab (int8)
            pl.BlockSpec((1, tile_r, 1), lambda r, mp: (mp, r, 0)),  # deg^{-1/2} rows
            pl.BlockSpec((m, n, f_pad), lambda r, mp: (0, 0, 0)),    # D^{-1/2} XW (resident)
            pl.BlockSpec((m, 1, f_pad), lambda r, mp: (0, 0, 0)),    # biases (resident)
            pl.BlockSpec((f_pad, hid), lambda r, mp: (0, 0)),        # attention W1 (padded)
            pl.BlockSpec((1, hid), lambda r, mp: (0, 0)),            # attention b1
            pl.BlockSpec((1, hid), lambda r, mp: (0, 0)),            # attention w2 (as row)
        ],
        out_specs=pl.BlockSpec((tile_r, f_pad), lambda r, mp: (r, 0)),
        scratch_shapes=[
            pltpu.VMEM((tile_r, 1), jnp.float32),       # running max
            pltpu.VMEM((tile_r, 1), jnp.float32),       # running denominator
            pltpu.VMEM((tile_r, f_pad), jnp.float32),   # running weighted sum of z_m
        ],
        compiler_params=pltpu.CompilerParams(
            dimension_semantics=("parallel", "arbitrary"),  # megacore over row tiles (v7x)
            vmem_limit_bytes=vmem_limit_bytes,
        ),
    )(adjs_i8, dis, xws, b_p, w1_p, attn_b1, w2_row)

    return out_pad[:, :f_out]


# ---------------------------------------------------------------------------
# Pure-JAX f32 reference (mirrors the PyTorch module) for sanity checking.
# ---------------------------------------------------------------------------
def _reference_forward(h, adjs, gcn_w, gcn_b, attn_w1, attn_b1, attn_w2):
    m, n, _ = adjs.shape
    eye = jnp.eye(n, dtype=h.dtype)
    zs = []
    for i in range(m):
        a_hat = adjs[i] + eye
        dr = lax.rsqrt(jnp.sum(a_hat, axis=1, keepdims=True))
        dc = lax.rsqrt(jnp.sum(a_hat, axis=0, keepdims=True))
        a_norm = dr * a_hat * dc
        zs.append(a_norm @ (h @ gcn_w[i]) + gcn_b[i])
    z = jnp.stack(zs, axis=1)                           # [N, M, F_out]
    w = jnp.tanh(z @ attn_w1 + attn_b1[0]) @ attn_w2    # [N, M, 1]
    beta = jax.nn.softmax(w, axis=1)
    return jnp.sum(beta * z, axis=1)


if __name__ == "__main__":
    # Small shapes consistent with the module (2 row tiles exercise the tiled path).
    NUM_META_PATHS = 3
    N = 256          # nodes
    IN_SIZE = 32
    OUT_SIZE = 32
    HIDDEN = 128     # SemanticAttention default hidden_size
    TILE_R = 128

    key = jax.random.PRNGKey(0)
    k_h, k_a, k_w, k_b, k_w1, k_b1, k_w2 = jax.random.split(key, 7)

    h = jax.random.normal(k_h, (N, IN_SIZE), dtype=jnp.float32)

    # Random symmetric 0/1 adjacency per meta-path, stored as int8 (kernel's HBM format).
    a_rand = jax.random.bernoulli(k_a, 0.1, (NUM_META_PATHS, N, N))
    adjs_bool = jnp.logical_or(a_rand, jnp.transpose(a_rand, (0, 2, 1)))
    adjs_i8 = adjs_bool.astype(jnp.int8)
    # Symmetry is a hard requirement of the normalization identity used in the kernel.
    assert bool(jnp.all(adjs_i8 == jnp.transpose(adjs_i8, (0, 2, 1))))
    adjs_f32 = adjs_i8.astype(jnp.float32)              # for the reference only

    # Deterministic synthetic parameters (shapes match the torch module).
    gcn_w = 0.1 * jax.random.normal(k_w, (NUM_META_PATHS, IN_SIZE, OUT_SIZE), jnp.float32)
    gcn_b = 0.1 * jax.random.normal(k_b, (NUM_META_PATHS, 1, OUT_SIZE), jnp.float32)
    attn_w1 = 0.1 * jax.random.normal(k_w1, (OUT_SIZE, HIDDEN), jnp.float32)
    attn_b1 = 0.1 * jax.random.normal(k_b1, (1, HIDDEN), jnp.float32)
    attn_w2 = 0.1 * jax.random.normal(k_w2, (HIDDEN, 1), jnp.float32)

    out = hgcn_layer_forward(h, adjs_i8, gcn_w, gcn_b, attn_w1, attn_b1, attn_w2,
                             tile_r=TILE_R)
    out = jax.block_until_ready(out)

    ref = _reference_forward(h, adjs_f32, gcn_w, gcn_b, attn_w1, attn_b1, attn_w2)
    assert out.shape == (N, OUT_SIZE)
    # Tolerance accounts for the intentional bf16 storage of D^{-1/2} XW and the bf16 MXU
    # feed of the adjacency aggregation.
    assert jnp.allclose(out, ref, atol=3e-2, rtol=3e-2), "mismatch vs reference"

    print("KERNEL_OK")
</pallas_src>

<mosaic_0001>
module attributes {stable_mosaic.version = 11 : i64} {
  func.func @_hgcn_fused_kernel(%arg0: i32, %arg1: i32, %arg2: memref<1x128x256xi8, #tpu.memory_space<vmem>>, %arg3: memref<1x128x1xf32, #tpu.memory_space<vmem>>, %arg4: memref<3x256x128xbf16, #tpu.memory_space<vmem>>, %arg5: memref<3x1x128xf32, #tpu.memory_space<vmem>>, %arg6: memref<128x128xf32, #tpu.memory_space<vmem>>, %arg7: memref<1x128xf32, #tpu.memory_space<vmem>>, %arg8: memref<1x128xf32, #tpu.memory_space<vmem>>, %arg9: memref<128x128xf32, #tpu.memory_space<vmem>>, %arg10: memref<128x1xf32, #tpu.memory_space<vmem>>, %arg11: memref<128x1xf32, #tpu.memory_space<vmem>>, %arg12: memref<128x128xf32, #tpu.memory_space<vmem>>) attributes {dimension_semantics = [#tpu.dimension_semantics<parallel>, #tpu.dimension_semantics<arbitrary>], iteration_bounds = array<i64: 2, 3>, scalar_prefetch = 0 : i64, scratch_operands = 3 : i64, tpu.core_type = #tpu.core_type<tc>, window_params = [{transform_indices = @transform_0, window_bounds = array<i64: 1, 128, 256>}, {transform_indices = @transform_1, window_bounds = array<i64: 1, 128, 1>}, {pipeline_mode = #tpu.pipeline_mode<synchronous>, transform_indices = @transform_2, window_bounds = array<i64: 3, 256, 128>}, {pipeline_mode = #tpu.pipeline_mode<synchronous>, transform_indices = @transform_3, window_bounds = array<i64: 3, 1, 128>}, {pipeline_mode = #tpu.pipeline_mode<synchronous>, transform_indices = @transform_4, window_bounds = array<i64: 128, 128>}, {pipeline_mode = #tpu.pipeline_mode<synchronous>, transform_indices = @transform_5, window_bounds = array<i64: 1, 128>}, {pipeline_mode = #tpu.pipeline_mode<synchronous>, transform_indices = @transform_6, window_bounds = array<i64: 1, 128>}, {transform_indices = @transform_7, window_bounds = array<i64: 128, 128>}]} {
    %c0_i32 = arith.constant 0 : i32
    %0 = arith.cmpi eq, %arg1, %c0_i32 : i32
    %1 = arith.extui %0 : i1 to i32
    %c0_i32_0 = arith.constant 0 : i32
    %2 = arith.cmpi ne, %1, %c0_i32_0 : i32
    scf.if %2 {
      %cst_34 = arith.constant 0xFF800000 : f32
      %61 = vector.broadcast %cst_34 : f32 to vector<128x1xf32>
      %c0_35 = arith.constant 0 : index
      %c0_36 = arith.constant 0 : index
      %62 = vector.load %arg10[%c0_35, %c0_36] : memref<128x1xf32, #tpu.memory_space<vmem>>, vector<128x1xf32>
      tpu.vector_store %arg10[%c0_35, %c0_36], %61 {strides = array<i32>} : memref<128x1xf32, #tpu.memory_space<vmem>>, vector<128x1xf32>,
      %cst_37 = arith.constant 0.000000e+00 : f32
      %63 = vector.broadcast %cst_37 : f32 to vector<128x1xf32>
      %c0_38 = arith.constant 0 : index
      %c0_39 = arith.constant 0 : index
      %64 = vector.load %arg11[%c0_38, %c0_39] : memref<128x1xf32, #tpu.memory_space<vmem>>, vector<128x1xf32>
      tpu.vector_store %arg11[%c0_38, %c0_39], %63 {strides = array<i32>} : memref<128x1xf32, #tpu.memory_space<vmem>>, vector<128x1xf32>,
      %cst_40 = arith.constant 0.000000e+00 : f32
      %65 = vector.broadcast %cst_40 : f32 to vector<128x128xf32>
      %c0_41 = arith.constant 0 : index
      %c0_42 = arith.constant 0 : index
      %66 = vector.load %arg12[%c0_41, %c0_42] : memref<128x128xf32, #tpu.memory_space<vmem>>, vector<128x128xf32>
      tpu.vector_store %arg12[%c0_41, %c0_42], %65 {strides = array<i32>} : memref<128x128xf32, #tpu.memory_space<vmem>>, vector<128x128xf32>,
    } else {
    }
    %c128_i32 = arith.constant 128 : i32
    %3 = arith.muli %arg0, %c128_i32 : i32
    %4 = tpu.assume_multiple %3, 128 : i32
    %c0 = arith.constant 0 : index
    %c0_1 = arith.constant 0 : index
    %c0_2 = arith.constant 0 : index
    %5 = vector.load %arg2[%c0, %c0_1, %c0_2] : memref<1x128x256xi8, #tpu.memory_space<vmem>>, vector<1x128x256xi8>
    %6 = vector.shape_cast %5 : vector<1x128x256xi8> to vector<128x256xi8>
    %7 = arith.sitofp %6 : vector<128x256xi8> to vector<128x256xf32>
    %8 = arith.truncf %7 : vector<128x256xf32> to vector<128x256xbf16>
    %c0_3 = arith.constant 0 : index
    %c0_4 = arith.constant 0 : index
    %c0_5 = arith.constant 0 : index
    %9 = vector.load %arg3[%c0_3, %c0_4, %c0_5] : memref<1x128x1xf32, #tpu.memory_space<vmem>>, vector<1x128x1xf32>
    %10 = vector.shape_cast %9 : vector<1x128x1xf32> to vector<128x1xf32>
    %11 = arith.index_cast %arg1 : i32 to index
    %c0_6 = arith.constant 0 : index
    %c0_7 = arith.constant 0 : index
    %12 = vector.load %arg4[%11, %c0_6, %c0_7] : memref<3x256x128xbf16, #tpu.memory_space<vmem>>, vector<1x256x128xbf16>
    %13 = vector.shape_cast %12 : vector<1x256x128xbf16> to vector<256x128xbf16>
    %14 = arith.index_cast %arg1 : i32 to index
    %15 = arith.index_cast %4 : i32 to index
    %c0_8 = arith.constant 0 : index
    %16 = vector.load %arg4[%14, %15, %c0_8] : memref<3x256x128xbf16, #tpu.memory_space<vmem>>, vector<1x128x128xbf16>
    %17 = vector.shape_cast %16 : vector<1x128x128xbf16> to vector<128x128xbf16>
    %18 = arith.extf %17 : vector<128x128xbf16> to vector<128x128xf32>
    %cst = arith.constant dense<0.000000e+00> : vector<128x128xf32>
    %19 = tpu.matmul %8, %13, %cst {dimension_numbers = #tpu.dot_dimension_numbers<[1], [0], [0], [1], [0, 0, 1, 1], [], []>} : vector<128x256xbf16>, vector<256x128xbf16>, vector<128x128xf32> -> vector<128x128xf32>
    %20 = arith.addf %19, %18 : vector<128x128xf32>
    %21 = vector.broadcast %10 : vector<128x1xf32> to vector<128x128xf32>
    %22 = arith.mulf %21, %20 : vector<128x128xf32>
    %23 = arith.index_cast %arg1 : i32 to index
    %c0_9 = arith.constant 0 : index
    %c0_10 = arith.constant 0 : index
    %24 = vector.load %arg5[%23, %c0_9, %c0_10] : memref<3x1x128xf32, #tpu.memory_space<vmem>>, vector<1x1x128xf32>
    %25 = vector.shape_cast %24 : vector<1x1x128xf32> to vector<1x128xf32>
    %26 = vector.broadcast %25 : vector<1x128xf32> to vector<128x128xf32>
    %27 = arith.addf %22, %26 : vector<128x128xf32>
    %c0_11 = arith.constant 0 : index
    %c0_12 = arith.constant 0 : index
    %28 = vector.load %arg6[%c0_11, %c0_12] : memref<128x128xf32, #tpu.memory_space<vmem>>, vector<128x128xf32>
    %cst_13 = arith.constant dense<0.000000e+00> : vector<128x128xf32>
    %29 = tpu.matmul %27, %28, %cst_13 {dimension_numbers = #tpu.dot_dimension_numbers<[1], [0], [0], [1], [0, 0, 1, 1], [], []>} : vector<128x128xf32>, vector<128x128xf32>, vector<128x128xf32> -> vector<128x128xf32>
    %c0_14 = arith.constant 0 : index
    %c0_15 = arith.constant 0 : index
    %30 = vector.load %arg7[%c0_14, %c0_15] : memref<1x128xf32, #tpu.memory_space<vmem>>, vector<1x128xf32>
    %31 = vector.broadcast %30 : vector<1x128xf32> to vector<128x128xf32>
    %32 = arith.addf %29, %31 : vector<128x128xf32>
    %33 = math.tanh %32 : vector<128x128xf32>
    %c0_16 = arith.constant 0 : index
    %c0_17 = arith.constant 0 : index
    %34 = vector.load %arg8[%c0_16, %c0_17] : memref<1x128xf32, #tpu.memory_space<vmem>>, vector<1x128xf32>
    %35 = vector.broadcast %34 : vector<1x128xf32> to vector<128x128xf32>
    %36 = arith.mulf %33, %35 : vector<128x128xf32>
    %cst_18 = arith.constant dense<0.000000e+00> : vector<128xf32>
    %37 = vector.multi_reduction <add>, %36, %cst_18 [1] : vector<128x128xf32> to vector<128xf32>
    %38 = vector.shape_cast %37 : vector<128xf32> to vector<128x1xf32>
    %c0_19 = arith.constant 0 : index
    %c0_20 = arith.constant 0 : index
    %39 = vector.load %arg10[%c0_19, %c0_20] : memref<128x1xf32, #tpu.memory_space<vmem>>, vector<128x1xf32>
    %40 = arith.maximumf %39, %38 : vector<128x1xf32>
    %c0_21 = arith.constant 0 : index
    %c0_22 = arith.constant 0 : index
    %41 = vector.load %arg10[%c0_21, %c0_22] : memref<128x1xf32, #tpu.memory_space<vmem>>, vector<128x1xf32>
    %42 = arith.subf %41, %40 : vector<128x1xf32>
    %43 = math.exp %42 : vector<128x1xf32>
    %44 = arith.subf %38, %40 : vector<128x1xf32>
    %45 = math.exp %44 : vector<128x1xf32>
    %c0_23 = arith.constant 0 : index
    %c0_24 = arith.constant 0 : index
    %46 = vector.load %arg11[%c0_23, %c0_24] : memref<128x1xf32, #tpu.memory_space<vmem>>, vector<128x1xf32>
    %47 = arith.mulf %43, %46 : vector<128x1xf32>
    %48 = arith.addf %47, %45 : vector<128x1xf32>
    %c0_25 = arith.constant 0 : index
    %c0_26 = arith.constant 0 : index
    %49 = vector.load %arg11[%c0_25, %c0_26] : memref<128x1xf32, #tpu.memory_space<vmem>>, vector<128x1xf32>
    tpu.vector_store %arg11[%c0_25, %c0_26], %48 {strides = array<i32>} : memref<128x1xf32, #tpu.memory_space<vmem>>, vector<128x1xf32>,
    %c0_27 = arith.constant 0 : index
    %c0_28 = arith.constant 0 : index
    %50 = vector.load %arg12[%c0_27, %c0_28] : memref<128x128xf32, #tpu.memory_space<vmem>>, vector<128x128xf32>
    %51 = vector.broadcast %43 : vector<128x1xf32> to vector<128x128xf32>
    %52 = arith.mulf %51, %50 : vector<128x128xf32>
    %53 = vector.broadcast %45 : vector<128x1xf32> to vector<128x128xf32>
    %54 = arith.mulf %53, %27 : vector<128x128xf32>
    %55 = arith.addf %52, %54 : vector<128x128xf32>
    %c0_29 = arith.constant 0 : index
    %c0_30 = arith.constant 0 : index
    %56 = vector.load %arg12[%c0_29, %c0_30] : memref<128x128xf32, #tpu.memory_space<vmem>>, vector<128x128xf32>
    tpu.vector_store %arg12[%c0_29, %c0_30], %55 {strides = array<i32>} : memref<128x128xf32, #tpu.memory_space<vmem>>, vector<128x128xf32>,
    %c0_31 = arith.constant 0 : index
    %c0_32 = arith.constant 0 : index
    %57 = vector.load %arg10[%c0_31, %c0_32] : memref<128x1xf32, #tpu.memory_space<vmem>>, vector<128x1xf32>
    tpu.vector_store %arg10[%c0_31, %c0_32], %40 {strides = array<i32>} : memref<128x1xf32, #tpu.memory_space<vmem>>, vector<128x1xf32>,
    %c2_i32 = arith.constant 2 : i32
    %58 = arith.cmpi eq, %arg1, %c2_i32 : i32
    %59 = arith.extui %58 : i1 to i32
    %c0_i32_33 = arith.constant 0 : i32
    %60 = arith.cmpi ne, %59, %c0_i32_33 : i32
    scf.if %60 {
      %c0_34 = arith.constant 0 : index
      %c0_35 = arith.constant 0 : index
      %61 = vector.load %arg12[%c0_34, %c0_35] : memref<128x128xf32, #tpu.memory_space<vmem>>, vector<128x128xf32>
      %c0_36 = arith.constant 0 : index
      %c0_37 = arith.constant 0 : index
      %62 = vector.load %arg11[%c0_36, %c0_37] : memref<128x1xf32, #tpu.memory_space<vmem>>, vector<128x1xf32>
      %cst_38 = arith.constant 1.000000e+00 : f32
      %63 = vector.broadcast %cst_38 : f32 to vector<128x1xf32>
      %64 = arith.divf %63, %62 : vector<128x1xf32>
      %65 = vector.broadcast %64 : vector<128x1xf32> to vector<128x128xf32>
      %66 = arith.mulf %61, %65 : vector<128x128xf32>
      %c0_39 = arith.constant 0 : index
      %c0_40 = arith.constant 0 : index
      %67 = vector.load %arg9[%c0_39, %c0_40] : memref<128x128xf32, #tpu.memory_space<vmem>>, vector<128x128xf32>
      tpu.vector_store %arg9[%c0_39, %c0_40], %66 {strides = array<i32>} : memref<128x128xf32, #tpu.memory_space<vmem>>, vector<128x128xf32>,
    } else {
    }
    return
  }
  func.func @transform_0(%arg0: i32, %arg1: i32) -> (i32, i32, i32) {
    %c0_i32 = arith.constant 0 : i32
    %c0_i32_0 = arith.constant 0 : i32
    return %arg1, %arg0, %c0_i32 : i32, i32, i32
  }
  func.func @transform_1(%arg0: i32, %arg1: i32) -> (i32, i32, i32) {
    %c0_i32 = arith.constant 0 : i32
    %c0_i32_0 = arith.constant 0 : i32
    return %arg1, %arg0, %c0_i32 : i32, i32, i32
  }
  func.func @transform_2(%arg0: i32, %arg1: i32) -> (i32, i32, i32) {
    %c0_i32 = arith.constant 0 : i32
    %c0_i32_0 = arith.constant 0 : i32
    %c0_i32_1 = arith.constant 0 : i32
    %c0_i32_2 = arith.constant 0 : i32
    return %c0_i32, %c0_i32_0, %c0_i32_1 : i32, i32, i32
  }
  func.func @transform_3(%arg0: i32, %arg1: i32) -> (i32, i32, i32) {
    %c0_i32 = arith.constant 0 : i32
    %c0_i32_0 = arith.constant 0 : i32
    %c0_i32_1 = arith.constant 0 : i32
    %c0_i32_2 = arith.constant 0 : i32
    return %c0_i32, %c0_i32_0, %c0_i32_1 : i32, i32, i32
  }
  func.func @transform_4(%arg0: i32, %arg1: i32) -> (i32, i32) {
    %c0_i32 = arith.constant 0 : i32
    %c0_i32_0 = arith.constant 0 : i32
    %c0_i32_1 = arith.constant 0 : i32
    return %c0_i32, %c0_i32_0 : i32, i32
  }
  func.func @transform_5(%arg0: i32, %arg1: i32) -> (i32, i32) {
    %c0_i32 = arith.constant 0 : i32
    %c0_i32_0 = arith.constant 0 : i32
    %c0_i32_1 = arith.constant 0 : i32
    return %c0_i32, %c0_i32_0 : i32, i32
  }
  func.func @transform_6(%arg0: i32, %arg1: i32) -> (i32, i32) {
    %c0_i32 = arith.constant 0 : i32
    %c0_i32_0 = arith.constant 0 : i32
    %c0_i32_1 = arith.constant 0 : i32
    return %c0_i32, %c0_i32_0 : i32, i32
  }
  func.func @transform_7(%arg0: i32, %arg1: i32) -> (i32, i32) {
    %c0_i32 = arith.constant 0 : i32
    %c0_i32_0 = arith.constant 0 : i32
    return %arg0, %c0_i32 : i32, i32
  }
}

</mosaic_0001>

<bundles_post_ra>
// kernel: hgcn_layer_forward.1
= control target key start
LH: loop header
LB: loop body
LE: loop exit
PB: predicated region body
PF: predicated region fallthrough
CT: control target
= control target key end

     0   :  { %s2338_s24 = smov 0   ;;  %s2340_s25 = smov 0   ;;  %s2729_s0 = inlined_call_operand.vmem [shape: s8[3,256,256], index: 0, kind: input, shape index: {}]   ;;  %s2730_s1 = inlined_call_operand.vmem [shape: f32[3,256,1], index: 1, kind: input, shape index: {}]   ;;  %s2731_s2 = inlined_call_operand.vmem [shape: bf16[3,256,128], index: 2, kind: input, shape index: {}]   ;;  %s2732_s3 = inlined_call_operand.vmem [shape: f32[3,1,128], index: 3, kind: input, shape index: {}]   ;;  %s2733_s4 = inlined_call_operand.vmem [shape: f32[128,128], index: 4, kind: input, shape index: {}]   ;;  %s2734_s5 = inlined_call_operand.vmem [shape: f32[1,128], index: 5, kind: input, shape index: {}]   ;;  %s2735_s6 = inlined_call_operand.vmem [shape: f32[1,128], index: 6, kind: input, shape index: {}]   ;;  %s2736_s7 = inlined_call_operand.vmem [shape: f32[256,128], index: 7, kind: output, shape index: {}]  }
   0x1   :  { %s2342_s26 = smov 0   ;;  %s2344_s27 = smov 0  }
   0x2   :  { %s2346_s28 = smov 0  }
   0x3 LB: > { %s26_s29 = sadd.s32 1, %s2284_s26  ;;  %s29_s30 = sadd.s32 1, %s2288_s27  ;;  %s2292_s28 = sphi %s2346_s28, %s17_s28   ;;  %s2288_s27 = sphi %s2344_s27, %s2744_s27   ;;  %s2284_s26 = sphi %s2342_s26, %s2743_s26   ;;  %s2280_s25 = sphi %s2340_s25, %s2742_s25   ;;  %s2276_s24 = sphi %s2338_s24, %s2741_s24  }
   0x4   : > { %p27_p0 = scmp.ge.s32.totalorder %s26_s29, 3  ;;  %p1801_p1 = scmp.ge.s32.totalorder %s2292_s28, 1 }
   0x5   : > { %p274_p2 = scmp.lt.s32.totalorder %s2292_s28, 7 }
   0x6   : > { %s2746_s29 = smov (%p27_p0, %s26_s29), 0  ;;  %s2748_s30 = smov (!%p27_p0, %s29_s30), %s2288_s27 }
   0x7   : > { %2737 = sst [smem:[#allocation5_spill]] %s2746_s29  ;;  %p275_p3 = pnand %p1801_p1, %p274_p2 }
   0x8   : > { %p31_p4 = scmp.ge.s32.totalorder %s2748_s30, 2  ;;  %s1802_s8 = sshll.u32 (!%p275_p3), %s2280_s25, 2 }
   0x9   : > { %278 = sbr.rel (%p275_p3) target bundleno = 1044 (0x414), region = 48  ;;  %p321_p5 = scmp.lt.s32.totalorder (!%p275_p3), %s2276_s24, 2 }
   0xa   : > { %s2750_s30 = smov (%p31_p4, %s2748_s30), 0  ;;  %p323_p6 = scmp.lt.s32.totalorder (!%p275_p3), %s1802_s8, 7 }
   0xb   : > { %2738 = sst [smem:[#allocation6_spill]] %s2750_s30  ;;  %s1806_s9 = sshll.u32 (!%p275_p3), %s2280_s25, 4 }
   0xc   : > { %p334_p7 = scmp.lt.s32.totalorder (!%p275_p3), %s1806_s9, 31  ;;  %p1811_p8 = scmp.ne.s32.totalorder (!%p275_p3), %s2276_s24, 0 }
  0x10   : > { %s322_s10 = scalar_select %p321_p5, %s2276_s24, 2 }
  0x11   : > { %s2752_s8 = smov (!%p323_p6, %s1802_s8), 7  ;;  %s2754_s9 = smov (!%p334_p7, %s1806_s9), 31 }
  0x12   : > { %s1804_s11 = sshll.u32 %s322_s10, 4  ;;  %s1803_s12 = sshll.u32 %s2752_s8, 1  ;;  %vm352_vm0 = vcmask (!%p1811_p8), 7168   ;;  %v2294_v0 = vmov (!%p1811_p8), -inf   ;;  %v2295_v1 = vmov (!%p1811_p8), 0.0  }
  0x13   : > { %s327_s13 = sadd.s32 %s1804_s11, %s1803_s12  ;;  %s1807_s18 = sshll.u32 %s322_s10, 5  ;;  %353 = vst.msk [vmem:[#allocation2] sm:$0xff] (!%p1811_p8), %vm352_vm0, %v2294_v0  ;;  %354 = vst.msk [vmem:[#allocation2 + $0x8] sm:$0xff] (!%p1811_p8), %vm352_vm0, %v2294_v0 }
  0x14   : > { %s1805_s14 = sshll.u32 %s327_s13, 3  ;;  %s337_s19 = sadd.s32 %s1807_s18, %s2754_s9  ;;  %355 = vst.msk [vmem:[#allocation2 + $0x10] sm:$0xff] (!%p1811_p8), %vm352_vm0, %v2294_v0  ;;  %356 = vst.msk [vmem:[#allocation2 + $0x18] sm:$0xff] (!%p1811_p8), %vm352_vm0, %v2294_v0 }
  0x15   : > { %s2379_s17 = scalar_lea.vmem %s2729_s0, %s1805_s14  ;;  %s1810_s20 = sshll.u32 %s2754_s9, 3  ;;  %357 = vst.msk [vmem:[#allocation2 + $0x20] sm:$0xff] (!%p1811_p8), %vm352_vm0, %v2294_v0  ;;  %358 = vst.msk [vmem:[#allocation2 + $0x28] sm:$0xff] (!%p1811_p8), %vm352_vm0, %v2294_v0 }
  0x16   : > { %s1808_s21 = sshll.u32 %s337_s19, 3  ;;  %s2384_s30 = scalar_lea.vmem %s2736_s7, %s1810_s20  ;;  %359 = vst.msk [vmem:[#allocation2 + $0x30] sm:$0xff] (!%p1811_p8), %vm352_vm0, %v2294_v0  ;;  %360 = vst.msk [vmem:[#allocation2 + $0x38] sm:$0xff] (!%p1811_p8), %vm352_vm0, %v2294_v0 }
  0x17   : > { %s2389_s11 = scalar_lea.vmem %s2730_s1, %s1808_s21  ;;  %351 = sbr.rel (%p1811_p8) target bundleno = 43 (0x2b), region = 52  ;;  %361 = vst.msk [vmem:[#allocation2 + $0x40] sm:$0xff] (!%p1811_p8), %vm352_vm0, %v2294_v0  ;;  %362 = vst.msk [vmem:[#allocation2 + $0x48] sm:$0xff] (!%p1811_p8), %vm352_vm0, %v2294_v0 }
  0x18   : > { %363 = vst.msk [vmem:[#allocation2 + $0x50] sm:$0xff] (!%p1811_p8), %vm352_vm0, %v2294_v0  ;;  %364 = vst.msk [vmem:[#allocation2 + $0x58] sm:$0xff] (!%p1811_p8), %vm352_vm0, %v2294_v0 }
  0x19   : > { %365 = vst.msk [vmem:[#allocation2 + $0x60] sm:$0xff] (!%p1811_p8), %vm352_vm0, %v2294_v0  ;;  %366 = vst.msk [vmem:[#allocation2 + $0x68] sm:$0xff] (!%p1811_p8), %vm352_vm0, %v2294_v0 }
  0x1a   : > { %367 = vst.msk [vmem:[#allocation2 + $0x70] sm:$0xff] (!%p1811_p8), %vm352_vm0, %v2294_v0  ;;  %368 = vst.msk [vmem:[#allocation2 + $0x78] sm:$0xff] (!%p1811_p8), %vm352_vm0, %v2294_v0 }
  0x1b   : > { %369 = vst.msk [vmem:[#allocation3] sm:$0xff] (!%p1811_p8), %vm352_vm0, %v2295_v1  ;;  %370 = vst.msk [vmem:[#allocation3 + $0x8] sm:$0xff] (!%p1811_p8), %vm352_vm0, %v2295_v1 }
  0x1c   : > { %371 = vst.msk [vmem:[#allocation3 + $0x10] sm:$0xff] (!%p1811_p8), %vm352_vm0, %v2295_v1  ;;  %372 = vst.msk [vmem:[#allocation3 + $0x18] sm:$0xff] (!%p1811_p8), %vm352_vm0, %v2295_v1 }
  0x1d   : > { %373 = vst.msk [vmem:[#allocation3 + $0x20] sm:$0xff] (!%p1811_p8), %vm352_vm0, %v2295_v1  ;;  %374 = vst.msk [vmem:[#allocation3 + $0x28] sm:$0xff] (!%p1811_p8), %vm352_vm0, %v2295_v1 }
  0x1e   : > { %375 = vst.msk [vmem:[#allocation3 + $0x30] sm:$0xff] %vm352_vm0, %v2295_v1  ;;  %376 = vst.msk [vmem:[#allocation3 + $0x38] sm:$0xff] %vm352_vm0, %v2295_v1 }
  0x1f   : > { %377 = vst.msk [vmem:[#allocation3 + $0x40] sm:$0xff] %vm352_vm0, %v2295_v1  ;;  %378 = vst.msk [vmem:[#allocation3 + $0x48] sm:$0xff] %vm352_vm0, %v2295_v1 }
  0x20   : > { %379 = vst.msk [vmem:[#allocation3 + $0x50] sm:$0xff] %vm352_vm0, %v2295_v1  ;;  %380 = vst.msk [vmem:[#allocation3 + $0x58] sm:$0xff] %vm352_vm0, %v2295_v1 }
  0x21   : > { %381 = vst.msk [vmem:[#allocation3 + $0x60] sm:$0xff] %vm352_vm0, %v2295_v1  ;;  %382 = vst.msk [vmem:[#allocation3 + $0x68] sm:$0xff] %vm352_vm0, %v2295_v1 }
  0x22   : > { %383 = vst.msk [vmem:[#allocation3 + $0x70] sm:$0xff] %vm352_vm0, %v2295_v1  ;;  %384 = vst.msk [vmem:[#allocation3 + $0x78] sm:$0xff] %vm352_vm0, %v2295_v1 }
  0x23   : > { %385 = vst [vmem:[#allocation4] sm:$0xff] %v2295_v1  ;;  %386 = vst [vmem:[#allocation4 + $0x8] sm:$0xff] %v2295_v1 }
  0x24   : > { %387 = vst [vmem:[#allocation4 + $0x10] sm:$0xff] %v2295_v1  ;;  %388 = vst [vmem:[#allocation4 + $0x18] sm:$0xff] %v2295_v1 }
  0x25   : > { %389 = vst [vmem:[#allocation4 + $0x20] sm:$0xff] %v2295_v1  ;;  %390 = vst [vmem:[#allocation4 + $0x28] sm:$0xff] %v2295_v1 }
  0x26   : > { %391 = vst [vmem:[#allocation4 + $0x30] sm:$0xff] %v2295_v1  ;;  %392 = vst [vmem:[#allocation4 + $0x38] sm:$0xff] %v2295_v1 }
  0x27   : > { %393 = vst [vmem:[#allocation4 + $0x40] sm:$0xff] %v2295_v1  ;;  %394 = vst [vmem:[#allocation4 + $0x48] sm:$0xff] %v2295_v1 }
  0x28   : > { %395 = vst [vmem:[#allocation4 + $0x50] sm:$0xff] %v2295_v1  ;;  %396 = vst [vmem:[#allocation4 + $0x58] sm:$0xff] %v2295_v1 }
  0x29   : > { %397 = vst [vmem:[#allocation4 + $0x60] sm:$0xff] %v2295_v1  ;;  %398 = vst [vmem:[#allocation4 + $0x68] sm:$0xff] %v2295_v1 }
  0x2a   : > { %399 = vst [vmem:[#allocation4 + $0x70] sm:$0xff] %v2295_v1  ;;  %400 = vst [vmem:[#allocation4 + $0x78] sm:$0xff] %v2295_v1 }
  0x2b PF: > { %s1838_s29 = sshll.u32 %s2276_s24, 7  ;;  %v2426_v2 = vld [vmem:[%s2379_s17 + $0x8] sm:$0xff]  ;;  %v2296_v4 = vmov 0   ;;  %v426_v16 = vld [vmem:[%s2389_s11] sm:$0xff]  ;;  %v428_v17 = vld [vmem:[%s2389_s11 + $0x10] sm:$0xff]  ;;  %s1812_s13 = sshll.u32 %s2280_s25, 7 }
  0x2c   : > { %s2431_s12 = scalar_lea.vmem %s2731_s2, %s1838_s29  ;;  %v411_v3 = vunpack.c.l.s8.bf16 %v2426_v2  ;;  %2106 = vset.pattern.permute.xlu0 %v2296_v4  ;;  %2107 = vset.pattern.permute.xlu1 %v2296_v4  ;;  %v427_v18 = vld [vmem:[%s2389_s11 + $0x8] sm:$0xff]  ;;  %v429_v20 = vld [vmem:[%s2389_s11 + $0x18] sm:$0xff]  ;;  %v430_v22 = vld [vmem:[%s2389_s11 + $0x20] sm:$0xff]  ;;  %v413_v41 = vunpack.c.h.s8.bf16 %v2426_v2  ;;  %s1813_s14 = sshll.u32 %s2276_s24, 5  ;;  %vm1242_vm1 = vcmask 7168  }
  0x2d   : > { %v2108_v5 = vld [vmem:[%s2431_s12 + $0x40] sm:$0xff]   ;;  %v2110_v7 = vld [vmem:[%s2431_s12 + $0x48] sm:$0xff]   ;;  %v2112_v9 = vld [vmem:[%s2431_s12 + $0x50] sm:$0xff]   ;;  %709 = vperm.xlu0 %2106, %v426_v16   ;;  %719 = vperm.xlu1 %2107, %v428_v17   ;;  %s477_s15 = sshra.s32 %s1812_s13, 3  ;;  %p1835_p9 = scmp.ne.s32.totalorder %s2276_s24, 2 }
  0x2e   : > { %v2109_v6 = vld [vmem:[%s2431_s12] sm:$0xff]   ;;  %642 = vmatprep.mubr.bf16.mxu0 %v411_v3  ;;  %1878 = vmatprep.subr.bf16.mxu0 %v2108_v5  ;;  %v2111_v8 = vld [vmem:[%s2431_s12 + $0x8] sm:$0xff]   ;;  %v2113_v10 = vld [vmem:[%s2431_s12 + $0x10] sm:$0xff]   ;;  %s479_s16 = sadd.s32 %s1813_s14, %s477_s15 }
  0x2f   : > { %1879 = vmatpush3.bf16.msra.mxu0 %v2109_v6  ;;  %v2114_v11 = vld [vmem:[%s2431_s12 + $0x58] sm:$0xff]   ;;  %v2116_v13 = vld [vmem:[%s2431_s12 + $0x60] sm:$0xff]   ;;  %v2118_v15 = vld [vmem:[%s2431_s12 + $0x68] sm:$0xff]   ;;  %s1815_s18 = sshll.u32 %s479_s16, 2 }
  0x30   : > { %1880 = vmatprep.subr.bf16.mxu0 %v2110_v7  ;;  %v2115_v12 = vld [vmem:[%s2431_s12 + $0x18] sm:$0xff]   ;;  %v2117_v14 = vld [vmem:[%s2431_s12 + $0x20] sm:$0xff]   ;;  %v2119_v19 = vld [vmem:[%s2431_s12 + $0x28] sm:$0xff]   ;;  %s2527_s20 = scalar_lea.vmem %s2731_s2, %s1815_s18 }
  0x31   : > { %v2120_v21 = vld [vmem:[%s2431_s12 + $0x70] sm:$0xff]   ;;  %714 = vperm.xlu0 %2106, %v427_v18   ;;  %724 = vperm.xlu1 %2107, %v429_v20   ;;  %v827_v23 = vld [vmem:[%s2733_s4] sm:$0xff]  ;;  %v828_v24 = vld [vmem:[%s2733_s4 + $0x8] sm:$0xff] }
  0x32   : > { %v2121_v25 = vld [vmem:[%s2431_s12 + $0x30] sm:$0xff]   ;;  %v431_v26 = vld [vmem:[%s2389_s11 + $0x28] sm:$0xff]  ;;  %v2030_v27 = vpack.c.bf16 %v828_v24, %v827_v23  ;;  %v2122_v28 = vld [vmem:[%s2431_s12 + $0x78] sm:$0xff]  }
  0x33   : > { %1881 = vmatpush3.bf16.msra.mxu0 %v2111_v8  ;;  %v829_v29 = vld [vmem:[%s2733_s4 + $0x10] sm:$0xff]  ;;  %v830_v30 = vld [vmem:[%s2733_s4 + $0x18] sm:$0xff]  ;;  %v402_v34 = vld [vmem:[%s2379_s17] sm:$0xff] }
  0x34   : > { %1882 = vmatprep.subr.bf16.mxu0 %v2112_v9  ;;  %2031 = vmatprep.subr.bf16.mxu1 %v2030_v27  ;;  %v2034_v31 = vpack.c.bf16 %v830_v30, %v829_v29  ;;  %v432_v32 = vld [vmem:[%s2389_s11 + $0x30] sm:$0xff]  ;;  %v2123_v33 = vld [vmem:[%s2431_s12 + $0x38] sm:$0xff]   ;;  %v831_v36 = vld [vmem:[%s2733_s4 + $0x20] sm:$0xff]  ;;  %v410_v39 = vunpack.c.l.s8.bf16 %v402_v34  ;;  %v412_v52 = vunpack.c.h.s8.bf16 %v402_v34 }
  0x35   : > { %729 = vperm.xlu0 %2106, %v430_v22   ;;  %734 = vperm.xlu1 %2107, %v431_v26   ;;  %v433_v35 = vld [vmem:[%s2389_s11 + $0x38] sm:$0xff]  ;;  %v832_v37 = vld [vmem:[%s2733_s4 + $0x28] sm:$0xff]  ;;  %v434_v40 = vld [vmem:[%s2389_s11 + $0x40] sm:$0xff] }
  0x36   : > { %2033 = vmatpush3.bf16.msra.mxu1 %v2030_v27  ;;  %v2038_v38 = vpack.c.bf16 %v832_v37, %v831_v36  ;;  %v435_v42 = vld [vmem:[%s2389_s11 + $0x48] sm:$0xff]  ;;  %v833_v43 = vld [vmem:[%s2733_s4 + $0x30] sm:$0xff]  ;;  %v834_v44 = vld [vmem:[%s2733_s4 + $0x38] sm:$0xff] }
  0x37   : > { %1883 = vmatpush3.bf16.msra.mxu0 %v2113_v10  ;;  %2035 = vmatprep.subr.bf16.mxu1 %v2034_v31  ;;  %v2042_v45 = vpack.c.bf16 %v834_v44, %v833_v43  ;;  %v436_v46 = vld [vmem:[%s2389_s11 + $0x50] sm:$0xff]  ;;  %v437_v47 = vld [vmem:[%s2389_s11 + $0x58] sm:$0xff]  ;;  %v835_v49 = vld [vmem:[%s2733_s4 + $0x40] sm:$0xff] }
  0x38   : > { %1884 = vmatprep.subr.bf16.mxu0 %v2114_v11  ;;  %v405_v48 = vld [vmem:[%s2379_s17 + $0x18] sm:$0xff]  ;;  %v836_v50 = vld [vmem:[%s2733_s4 + $0x48] sm:$0xff]  ;;  %v438_v53 = vld [vmem:[%s2389_s11 + $0x60] sm:$0xff] }
  0x39   : > { %739 = vperm.xlu0 %2106, %v432_v32   ;;  %744 = vperm.xlu1 %2107, %v433_v35   ;;  %v2046_v51 = vpack.c.bf16 %v836_v50, %v835_v49  ;;  %v415_v54 = vunpack.c.l.s8.bf16 %v405_v48  ;;  %v439_v55 = vld [vmem:[%s2389_s11 + $0x68] sm:$0xff]  ;;  %v440_v56 = vld [vmem:[%s2389_s11 + $0x70] sm:$0xff]  ;;  %v441_v58 = vld [vmem:[%s2389_s11 + $0x78] sm:$0xff]  ;;  %v417_v60 = vunpack.c.h.s8.bf16 %v405_v48 }
  0x3a   : > { %2037 = vmatpush3.bf16.msra.mxu1 %v2034_v31  ;;  %v404_v57 = vld [vmem:[%s2379_s17 + $0x10] sm:$0xff]  ;;  %v407_v61 = vld [vmem:[%s2379_s17 + $0x28] sm:$0xff]  ;;  %v406_v0 = vld [vmem:[%s2379_s17 + $0x20] sm:$0xff] }
  0x3b   : > { %1885 = vmatpush3.bf16.msra.mxu0 %v2115_v12  ;;  %2039 = vmatprep.subr.bf16.mxu1 %v2038_v38  ;;  %v414_v59 = vunpack.c.l.s8.bf16 %v404_v57  ;;  %v416_v62 = vunpack.c.h.s8.bf16 %v404_v57  ;;  %v419_v63 = vunpack.c.l.s8.bf16 %v407_v61  ;;  %v418_v1 = vunpack.c.l.s8.bf16 %v406_v0  ;;  %v409_v3 = vld [vmem:[%s2379_s17 + $0x38] sm:$0xff]  ;;  %v408_v6 = vld [vmem:[%s2379_s17 + $0x30] sm:$0xff]  ;;  %s803_s17 = scalar_lea.vmem %s2732_s3, %s2276_s24  ;;  %v1871_v30 = vld [vmem:[%s2527_s20 + $0x8] sm:$0xff]  }
  0x3c   : > { %1886 = vmatprep.subr.bf16.mxu0 %v2116_v13  ;;  %v421_v2 = vunpack.c.h.s8.bf16 %v407_v61  ;;  %v420_v4 = vunpack.c.h.s8.bf16 %v406_v0  ;;  %v423_v5 = vunpack.c.l.s8.bf16 %v409_v3  ;;  %v422_v7 = vunpack.c.l.s8.bf16 %v408_v6  ;;  %v837_v10 = vld [vmem:[%s2733_s4 + $0x50] sm:$0xff]  ;;  %v838_v11 = vld [vmem:[%s2733_s4 + $0x58] sm:$0xff]  ;;  %v839_v13 = vld [vmem:[%s2733_s4 + $0x60] sm:$0xff] }
  0x3d   : > { %749 = vperm.xlu0 %2106, %v434_v40   ;;  %754 = vperm.xlu1 %2107, %v435_v42   ;;  %v425_v8 = vunpack.c.h.s8.bf16 %v409_v3  ;;  %v424_v9 = vunpack.c.h.s8.bf16 %v408_v6  ;;  %v2050_v12 = vpack.c.bf16 %v838_v11, %v837_v10  ;;  %v841_v16 = vld [vmem:[%s2733_s4 + $0x70] sm:$0xff]  ;;  %v842_v17 = vld [vmem:[%s2733_s4 + $0x78] sm:$0xff]  ;;  %v2535_v31 = vld [vmem:[%s803_s17] ss:$0 sm:$0xff]  ;;  %v1845_v37 = vunpack.c.l.bf16 %v1871_v30 }
  0x3e   : > { %2041 = vmatpush3.bf16.msra.mxu1 %v2038_v38  ;;  %v2058_v18 = vpack.c.bf16 %v842_v17, %v841_v16  ;;  %v1846_v43 = vunpack.c.h.bf16 %v1871_v30  ;;  %v1872_v48 = vld [vmem:[%s2527_s20 + $0x10] sm:$0xff]  }
  0x3f   : > { %1887 = vmatpush3.bf16.msra.mxu0 %v2117_v14  ;;  %2043 = vmatprep.subr.bf16.mxu1 %v2042_v45  ;;  %v840_v14 = vld [vmem:[%s2733_s4 + $0x68] sm:$0xff] }
  0x40   : > { %1888 = vmatprep.subr.bf16.mxu0 %v2118_v15  ;;  %v2054_v15 = vpack.c.bf16 %v840_v14, %v839_v13 }
  0x41   : > { %759 = vperm.xlu0 %2106, %v436_v46   ;;  %764 = vperm.xlu1 %2107, %v437_v47  }
  0x42   : > { %2045 = vmatpush3.bf16.msra.mxu1 %v2042_v45 }
  0x43   : > { %1889 = vmatpush3.bf16.msra.mxu0 %v2119_v19  ;;  %2047 = vmatprep.subr.bf16.mxu1 %v2046_v51  ;;  %v1840_v19 = vld [vmem:[%s2527_s20] sm:$0xff]  }
  0x44   : > { %1890 = vmatprep.subr.bf16.mxu0 %v2120_v21  ;;  %v1841_v21 = vunpack.c.l.bf16 %v1840_v19  ;;  %v1842_v26 = vunpack.c.h.bf16 %v1840_v19 }
  0x45   : > { %769 = vperm.xlu0 %2106, %v438_v53   ;;  %774 = vperm.xlu1 %2107, %v439_v55  }
  0x46   : > { %2049 = vmatpush3.bf16.msra.mxu1 %v2046_v51 }
  0x47   : > { %1891 = vmatpush3.bf16.msra.mxu0 %v2121_v25  ;;  %2051 = vmatprep.subr.bf16.mxu1 %v2050_v12 }
  0x48   : > { %1892 = vmatprep.subr.bf16.mxu0 %v2122_v28 }
  0x49   : > { %779 = vperm.xlu0 %2106, %v440_v56   ;;  %784 = vperm.xlu1 %2107, %v441_v58  }
  0x4a   : > { %2053 = vmatpush3.bf16.msra.mxu1 %v2050_v12 }
  0x4b   : > { %1893 = vmatpush3.bf16.msra.mxu0 %v2123_v33  ;;  %2055 = vmatprep.subr.bf16.mxu1 %v2054_v15 }
  0x4e   : > { %643 = vmatmul.mubr.bf16.vlgmr.msra.gmra.mrb[0].mxu0 %v410_v39  ;;  %2057 = vmatpush3.bf16.msra.mxu1 %v2054_v15 }
  0x4f   : > { %650 = vmatprep.mubr.bf16.mxu0 %v413_v41  ;;  %2059 = vmatprep.subr.bf16.mxu1 %v2058_v18 }
  0x52   : > { %2061 = vmatpush3.bf16.msra.mxu1 %v2058_v18  ;;  %v1874_v18 = vld [vmem:[%s2527_s20 + $0x20] sm:$0xff]  }
  0x56   : > { %651 = vmatmul.mubr.bf16.gmra.mrb[4].mxu0 %v412_v52 }
  0x57   : > { %658 = vmatprep.mubr.bf16.mxu0 %v415_v54  ;;  %v1849_v54 = vunpack.c.l.bf16 %v1872_v48 }
  0x5e   : > { %659 = vmatmul.mubr.bf16.gmra.mrb[8].mxu0 %v414_v59  ;;  %v1850_v59 = vunpack.c.h.bf16 %v1872_v48 }
  0x5f   : > { %666 = vmatprep.mubr.bf16.mxu0 %v417_v60 }
  0x66   : > { %667 = vmatmul.mubr.bf16.gmra.mrb[12].mxu0 %v416_v62 }
  0x67   : > { %674 = vmatprep.mubr.bf16.mxu0 %v419_v63 }
  0x6e   : > { %675 = vmatmul.mubr.bf16.gmra.mrb[16].mxu0 %v418_v1  ;;  %v1873_v1 = vld [vmem:[%s2527_s20 + $0x18] sm:$0xff]  }
  0x6f   : > { %682 = vmatprep.mubr.bf16.mxu0 %v421_v2  ;;  %v1854_v12 = vunpack.c.h.bf16 %v1873_v1 }
  0x76   : > { %683 = vmatmul.mubr.bf16.gmra.mrb[20].mxu0 %v420_v4 }
  0x77   : > { %690 = vmatprep.mubr.bf16.mxu0 %v423_v5 }
  0x7e   : > { %691 = vmatmul.mubr.bf16.gmra.mrb[24].mxu0 %v422_v7  ;;  %v1853_v7 = vunpack.c.l.bf16 %v1873_v1 }
  0x7f   : > { %698 = vmatprep.mubr.bf16.mxu0 %v425_v8 }
  0x86   : > { %699 = vmatmul.mubr.bf16.gmra.mrb[28].mxu0 %v424_v9 }
  0xac   : > { %v710_v22 = vpop.permute.xlu0 %709  ;;  %v720_v39 = vpop.permute.xlu1 %719 }
  0xb0   : > { %v715_v34 = vpop.permute.xlu0 %714  ;;  %v725_v51 = vpop.permute.xlu1 %724 }
  0xb4   : > { %v730_v0 = vpop.permute.xlu0 %729  ;;  %v735_v4 = vpop.permute.xlu1 %734 }
  0xb8   : > { %v740_v17 = vpop.permute.xlu0 %739 }
 0x121   : > { %v1894_v20 = vpop.f32.mrb[0].mxu0 }
 0x122   : > { %v1895_v23 = vpop.f32.mrb[1].mxu0 }
 0x123   : > { %v1896_v24 = vadd.f32 %v1895_v23, %v1894_v20  ;;  %v1897_v25 = vpop.f32.mrb[2].mxu0 }
 0x124   : > { %v1898_v27 = vpop.f32.mrb[3].mxu0 }
 0x125   : > { %v645_v28 = vadd.f32 %v1896_v24, %v1841_v21  ;;  %v1899_v29 = vadd.f32 %v1898_v27, %v1897_v25  ;;  %v745_v21 = vpop.permute.xlu1 %744  ;;  %v1857_v24 = vunpack.c.l.bf16 %v1874_v18 }
 0x127   : > { %v648_v32 = vadd.f32 %v1899_v29, %v1842_v26  ;;  %v787_v33 = vmul.f32 %v710_v22, %v645_v28  ;;  %v1858_v29 = vunpack.c.h.bf16 %v1874_v18 }
 0x129   : > { %v788_v35 = vmul.f32 %v715_v34, %v648_v32  ;;  %v1900_v36 = vpop.f32.mrb[4].mxu0  ;;  %v2538_v38 = vadd.f32 %v2535_v31, %v787_v33 }
 0x12a   : > { %v1901_v40 = vpop.f32.mrb[5].mxu0 }
 0x12b   : > { %v1902_v41 = vadd.f32 %v1901_v40, %v1900_v36  ;;  %v1903_v42 = vpop.f32.mrb[6].mxu0  ;;  %2006 = vmatprep.mubr.f32.mxu1 %v2538_v38  ;;  %v2542_v44 = vadd.f32 %v2535_v31, %v788_v35  ;;  %v750_v35 = vpop.permute.xlu0 %749  ;;  %v1875_v36 = vld [vmem:[%s2527_s20 + $0x28] sm:$0xff]  }
 0x12c   : > { %v1904_v45 = vpop.f32.mrb[7].mxu0  ;;  %v755_v40 = vpop.permute.xlu1 %754 }
 0x12d   : > { %v653_v46 = vadd.f32 %v1902_v41, %v1845_v37  ;;  %v1905_v47 = vadd.f32 %v1904_v45, %v1903_v42  ;;  %2007 = vmatmul.mubr.f32.vlgmr.msra.gmra.mrb[0].mxu1 %v2542_v44 }
 0x12f   : > { %v789_v49 = vmul.f32 %v720_v39, %v653_v46  ;;  %v656_v50 = vadd.f32 %v1905_v47, %v1846_v43  ;;  %v1861_v43 = vunpack.c.l.bf16 %v1875_v36 }
 0x131   : > { %v790_v52 = vmul.f32 %v725_v51, %v656_v50  ;;  %v1906_v53 = vpop.f32.mrb[8].mxu0  ;;  %v2547_v55 = vadd.f32 %v2535_v31, %v789_v49  ;;  %v1862_v49 = vunpack.c.h.bf16 %v1875_v36 }
 0x132   : > { %v1907_v56 = vpop.f32.mrb[9].mxu0 }
 0x133   : > { %v1908_v57 = vadd.f32 %v1907_v56, %v1906_v53  ;;  %v1909_v58 = vpop.f32.mrb[10].mxu0  ;;  %2009 = vmatprep.mubr.f32.mxu1 %v2547_v55  ;;  %v2551_v60 = vadd.f32 %v2535_v31, %v790_v52  ;;  %v1876_v56 = vld [vmem:[%s2527_s20 + $0x30] sm:$0xff]  }
 0x134   : > { %v1910_v61 = vpop.f32.mrb[11].mxu0 }
 0x135   : > { %v661_v62 = vadd.f32 %v1908_v57, %v1849_v54  ;;  %v1911_v63 = vadd.f32 %v1910_v61, %v1909_v58  ;;  %2010 = vmatmul.mubr.f32.gmra.mrb[2].mxu1 %v2551_v60  ;;  %v760_v54 = vpop.permute.xlu0 %759 }
 0x137   : > { %v791_v2 = vmul.f32 %v730_v0, %v661_v62  ;;  %v664_v3 = vadd.f32 %v1911_v63, %v1850_v59  ;;  %v765_v59 = vpop.permute.xlu1 %764  ;;  %v1865_v63 = vunpack.c.l.bf16 %v1876_v56 }
 0x139   : > { %v792_v5 = vmul.f32 %v735_v4, %v664_v3  ;;  %v1912_v6 = vpop.f32.mrb[12].mxu0  ;;  %v2556_v8 = vadd.f32 %v2535_v31, %v791_v2  ;;  %v1866_v4 = vunpack.c.h.bf16 %v1876_v56 }
 0x13a   : > { %v1913_v9 = vpop.f32.mrb[13].mxu0 }
 0x13b   : > { %v1914_v10 = vadd.f32 %v1913_v9, %v1912_v6  ;;  %v1915_v11 = vpop.f32.mrb[14].mxu0  ;;  %2012 = vmatprep.mubr.f32.mxu1 %v2556_v8  ;;  %v2560_v13 = vadd.f32 %v2535_v31, %v792_v5 }
 0x13c   : > { %v1916_v14 = vpop.f32.mrb[15].mxu0 }
 0x13d   : > { %v669_v15 = vadd.f32 %v1914_v10, %v1853_v7  ;;  %v1917_v16 = vadd.f32 %v1916_v14, %v1915_v11  ;;  %2013 = vmatmul.mubr.f32.gmra.mrb[4].mxu1 %v2560_v13  ;;  %v770_v10 = vpop.permute.xlu0 %769  ;;  %v1877_v11 = vld [vmem:[%s2527_s20 + $0x38] sm:$0xff]  }
 0x13e   : > { %v1869_v18 = vunpack.c.l.bf16 %v1877_v11 }
 0x13f   : > { %v793_v19 = vmul.f32 %v740_v17, %v669_v15  ;;  %v672_v20 = vadd.f32 %v1917_v16, %v1854_v12  ;;  %v775_v15 = vpop.permute.xlu1 %774 }
 0x141   : > { %v794_v22 = vmul.f32 %v745_v21, %v672_v20  ;;  %v1918_v23 = vpop.f32.mrb[16].mxu0  ;;  %v2565_v25 = vadd.f32 %v2535_v31, %v793_v19 }
 0x142   : > { %v1919_v26 = vpop.f32.mrb[17].mxu0 }
 0x143   : > { %v1920_v27 = vadd.f32 %v1919_v26, %v1918_v23  ;;  %v1921_v28 = vpop.f32.mrb[18].mxu0  ;;  %2015 = vmatprep.mubr.f32.mxu1 %v2565_v25  ;;  %v2569_v30 = vadd.f32 %v2535_v31, %v794_v22  ;;  %v1870_v23 = vunpack.c.h.bf16 %v1877_v11 }
 0x144   : > { %v1922_v32 = vpop.f32.mrb[19].mxu0 }
 0x145   : > { %v677_v33 = vadd.f32 %v1920_v27, %v1857_v24  ;;  %v1923_v34 = vadd.f32 %v1922_v32, %v1921_v28  ;;  %2016 = vmatmul.mubr.f32.gmra.mrb[6].mxu1 %v2569_v30 }
 0x147   : > { %v795_v37 = vmul.f32 %v750_v35, %v677_v33  ;;  %v680_v39 = vadd.f32 %v1923_v34, %v1858_v29  ;;  %v780_v29 = vpop.permute.xlu0 %779  ;;  %v785_v34 = vpop.permute.xlu1 %784 }
 0x149   : > { %v796_v41 = vmul.f32 %v755_v40, %v680_v39  ;;  %v1924_v42 = vpop.f32.mrb[20].mxu0  ;;  %v2574_v45 = vadd.f32 %v2535_v31, %v795_v37  ;;  %v2610_v39 = vld [vmem:[%s2734_s5] ss:$0 sm:$0xff] }
 0x14a   : > { %v1925_v46 = vpop.f32.mrb[21].mxu0 }
 0x14b   : > { %v1926_v47 = vadd.f32 %v1925_v46, %v1924_v42  ;;  %v1927_v48 = vpop.f32.mrb[22].mxu0  ;;  %2018 = vmatprep.mubr.f32.mxu1 %v2574_v45  ;;  %v2578_v50 = vadd.f32 %v2535_v31, %v796_v41 }
 0x14c   : > { %v1928_v51 = vpop.f32.mrb[23].mxu0 }
 0x14d   : > { %v685_v52 = vadd.f32 %v1926_v47, %v1861_v43  ;;  %v1929_v53 = vadd.f32 %v1928_v51, %v1927_v48  ;;  %2019 = vmatmul.mubr.f32.gmra.mrb[8].mxu1 %v2578_v50 }
 0x14f   : > { %v797_v57 = vmul.f32 %v760_v54, %v685_v52  ;;  %v688_v58 = vadd.f32 %v1929_v53, %v1862_v49  ;;  %v2619_v49 = vld [vmem:[%s2735_s6] ss:$0 sm:$0xff] }
 0x151   : > { %v798_v61 = vmul.f32 %v765_v59, %v688_v58  ;;  %v1930_v62 = vpop.f32.mrb[24].mxu0  ;;  %v2583_v0 = vadd.f32 %v2535_v31, %v797_v57 }
 0x152   : > { %v1931_v1 = vpop.f32.mrb[25].mxu0 }
 0x153   : > { %v1932_v2 = vadd.f32 %v1931_v1, %v1930_v62  ;;  %v1933_v3 = vpop.f32.mrb[26].mxu0  ;;  %2021 = vmatprep.mubr.f32.mxu1 %v2583_v0  ;;  %v2587_v5 = vadd.f32 %v2535_v31, %v798_v61 }
 0x154   : > { %v1934_v6 = vpop.f32.mrb[27].mxu0 }
 0x155   : > { %v693_v7 = vadd.f32 %v1932_v2, %v1865_v63  ;;  %v1935_v9 = vadd.f32 %v1934_v6, %v1933_v3  ;;  %2022 = vmatmul.mubr.f32.gmra.mrb[10].mxu1 %v2587_v5 }
 0x157   : > { %v799_v12 = vmul.f32 %v770_v10, %v693_v7  ;;  %v696_v14 = vadd.f32 %v1935_v9, %v1866_v4 }
 0x159   : > { %v800_v16 = vmul.f32 %v775_v15, %v696_v14  ;;  %v1936_v17 = vpop.f32.mrb[28].mxu0  ;;  %v2592_v19 = vadd.f32 %v2535_v31, %v799_v12 }
 0x15a   : > { %v1937_v20 = vpop.f32.mrb[29].mxu0 }
 0x15b   : > { %v1938_v21 = vadd.f32 %v1937_v20, %v1936_v17  ;;  %v1939_v22 = vpop.f32.mrb[30].mxu0  ;;  %2024 = vmatprep.mubr.f32.mxu1 %v2592_v19  ;;  %v2596_v24 = vadd.f32 %v2535_v31, %v800_v16 }
 0x15c   : > { %v1940_v26 = vpop.f32.mrb[31].mxu0 }
 0x15d   : > { %v701_v27 = vadd.f32 %v1938_v21, %v1869_v18  ;;  %v1941_v28 = vadd.f32 %v1940_v26, %v1939_v22  ;;  %2025 = vmatmul.mubr.f32.gmra.mrb[12].mxu1 %v2596_v24 }
 0x15f   : > { %v801_v32 = vmul.f32 %v780_v29, %v701_v27  ;;  %v704_v33 = vadd.f32 %v1941_v28, %v1870_v23 }
 0x161   : > { %v802_v35 = vmul.f32 %v785_v34, %v704_v33  ;;  %v2600_v36 = vadd.f32 %v2535_v31, %v801_v32 }
 0x163   : > { %2027 = vmatprep.mubr.f32.mxu1 %v2600_v36  ;;  %v2604_v37 = vadd.f32 %v2535_v31, %v802_v35 }
 0x165   : > { %2028 = vmatmul.mubr.f32.gmra.mrb[14].mxu1 %v2604_v37 }
 0x200   : > { %v2008_v40 = vpop.f32.mrb[0].mxu1 }
 0x201   : > { %v922_v41 = vadd.f32 %v2008_v40, %v2610_v39  ;;  %v916_v42 = vpop.f32.mrb[1].mxu1 }
 0x202   : > { %v917_v43 = vadd.f32 %v2610_v39, %v916_v42 }
 0x203   : > { %2124 = vtanh.f32 %v922_v41 }
 0x204   : > { %2126 = vtanh.f32 %v917_v43 }
 0x208   : > { %v2011_v46 = vpop.f32.mrb[2].mxu1 }
 0x209   : > { %v932_v47 = vadd.f32 %v2011_v46, %v2610_v39  ;;  %v926_v31 = vpop.f32.mrb[3].mxu1 }
 0x20a   : > { %v927_v48 = vadd.f32 %v2610_v39, %v926_v31 }
 0x20b   : > { %2128 = vtanh.f32 %v932_v47 }
 0x20c   : > { %2130 = vtanh.f32 %v927_v48 }
 0x20d   : > { %v2125_v51 = vpop.eup %2124 }
 0x20e   : > { %v2127_v52 = vpop.eup %2126  ;;  %v1019_v53 = vmul.f32 %v2125_v51, %v2619_v49 }
 0x20f   : > { %v1018_v54 = vmul.f32 %v2127_v52, %v2619_v49 }
 0x210   : > { %1036 = vadd.xlane.f32.xlu1 %v1019_v53  ;;  %v2014_v56 = vpop.f32.mrb[4].mxu1 }
 0x211   : > { %v942_v57 = vadd.f32 %v2014_v56, %v2610_v39  ;;  %v936_v58 = vpop.f32.mrb[5].mxu1  ;;  %1034 = vadd.xlane.f32.xlu0 %v1018_v54 }
 0x212   : > { %v937_v59 = vadd.f32 %v2610_v39, %v936_v58 }
 0x213   : > { %2132 = vtanh.f32 %v942_v57 }
 0x214   : > { %2134 = vtanh.f32 %v937_v59 }
 0x215   : > { %v2129_v61 = vpop.eup %2128 }
 0x216   : > { %v1021_v62 = vmul.f32 %v2129_v61, %v2619_v49  ;;  %v2131_v63 = vpop.eup %2130 }
 0x217   : > { %v1020_v6 = vmul.f32 %v2131_v63, %v2619_v49  ;;  %v1067_v63 = vld [vmem:[#allocation2 + $0x8] sm:$0xff] }
 0x218   : > { %v2017_v1 = vpop.f32.mrb[6].mxu1  ;;  %1040 = vadd.xlane.f32.xlu0 %v1021_v62 }
 0x219   : > { %v952_v2 = vadd.f32 %v2017_v1, %v2610_v39  ;;  %v946_v3 = vpop.f32.mrb[7].mxu1 }
 0x21a   : > { %v947_v4 = vadd.f32 %v2610_v39, %v946_v3 }
 0x21b   : > { %2136 = vtanh.f32 %v952_v2 }
 0x21c   : > { %2138 = vtanh.f32 %v947_v4  ;;  %1038 = vadd.xlane.f32.xlu0 %v1020_v6 }
 0x21d   : > { %v2133_v7 = vpop.eup %2132 }
 0x21e   : > { %v2135_v9 = vpop.eup %2134  ;;  %v1023_v10 = vmul.f32 %v2133_v7, %v2619_v49 }
 0x21f   : > { %v1022_v11 = vmul.f32 %v2135_v9, %v2619_v49 }
 0x220   : > { %v2020_v12 = vpop.f32.mrb[8].mxu1  ;;  %1044 = vadd.xlane.f32.xlu0 %v1023_v10 }
 0x221   : > { %v962_v14 = vadd.f32 %v2020_v12, %v2610_v39  ;;  %v956_v15 = vpop.f32.mrb[9].mxu1  ;;  %1042 = vadd.xlane.f32.xlu1 %v1022_v11 }
 0x222   : > { %v957_v16 = vadd.f32 %v2610_v39, %v956_v15 }
 0x223   : > { %2140 = vtanh.f32 %v962_v14  ;;  %v1069_v14 = vld [vmem:[#allocation2 + $0x18] sm:$0xff] }
 0x224   : > { %2142 = vtanh.f32 %v957_v16 }
 0x225   : > { %v2137_v17 = vpop.eup %2136 }
 0x226   : > { %v2139_v18 = vpop.eup %2138  ;;  %v1025_v20 = vmul.f32 %v2137_v17, %v2619_v49 }
 0x227   : > { %v1024_v21 = vmul.f32 %v2139_v18, %v2619_v49  ;;  %v1068_v18 = vld [vmem:[#allocation2 + $0x10] sm:$0xff] }
 0x228   : > { %v2023_v22 = vpop.f32.mrb[10].mxu1  ;;  %1048 = vadd.xlane.f32.xlu0 %v1025_v20 }
 0x229   : > { %v972_v23 = vadd.f32 %v2023_v22, %v2610_v39  ;;  %v966_v26 = vpop.f32.mrb[11].mxu1  ;;  %1046 = vadd.xlane.f32.xlu1 %v1024_v21 }
 0x22a   : > { %v967_v27 = vadd.f32 %v2610_v39, %v966_v26 }
 0x22b   : > { %2144 = vtanh.f32 %v972_v23 }
 0x22c   : > { %2146 = vtanh.f32 %v967_v27 }
 0x22d   : > { %v2141_v28 = vpop.eup %2140 }
 0x22e   : > { %v2143_v29 = vpop.eup %2142  ;;  %v1027_v32 = vmul.f32 %v2141_v28, %v2619_v49  ;;  %v1071_v28 = vld [vmem:[#allocation2 + $0x28] sm:$0xff] }
 0x22f   : > { %v1026_v33 = vmul.f32 %v2143_v29, %v2619_v49  ;;  %v1195_v29 = vld [vmem:[#allocation3 + $0x8] sm:$0xff] }
 0x230   : > { %v2026_v34 = vpop.f32.mrb[12].mxu1  ;;  %1052 = vadd.xlane.f32.xlu0 %v1027_v32 }
 0x231   : > { %v982_v35 = vadd.f32 %v2026_v34, %v2610_v39  ;;  %v976_v40 = vpop.f32.mrb[13].mxu1  ;;  %1050 = vadd.xlane.f32.xlu1 %v1026_v33  ;;  %v1070_v34 = vld [vmem:[#allocation2 + $0x20] sm:$0xff] }
 0x232   : > { %v977_v41 = vadd.f32 %v2610_v39, %v976_v40 }
 0x233   : > { %2148 = vtanh.f32 %v982_v35 }
 0x234   : > { %2150 = vtanh.f32 %v977_v41  ;;  %v1194_v41 = vld [vmem:[#allocation3] sm:$0xff] }
 0x235   : > { %v2145_v42 = vpop.eup %2144 }
 0x236   : > { %v2147_v43 = vpop.eup %2146  ;;  %v1029_v46 = vmul.f32 %v2145_v42, %v2619_v49 }
 0x237   : > { %v1028_v47 = vmul.f32 %v2147_v43, %v2619_v49 }
 0x238   : > { %v2029_v31 = vpop.f32.mrb[14].mxu1  ;;  %1056 = vadd.xlane.f32.xlu0 %v1029_v46 }
 0x239   : > { %v992_v48 = vadd.f32 %v2029_v31, %v2610_v39  ;;  %v986_v51 = vpop.f32.mrb[15].mxu1  ;;  %1054 = vadd.xlane.f32.xlu1 %v1028_v47 }
 0x23a   : > { %v987_v52 = vadd.f32 %v2610_v39, %v986_v51  ;;  %v1066_v39 = vld [vmem:[#allocation2] sm:$0xff] }
 0x23b   : > { %2152 = vtanh.f32 %v992_v48 }
 0x23c   : > { %2154 = vtanh.f32 %v987_v52 }
 0x23d   : > { %v2149_v53 = vpop.eup %2148 }
 0x23e   : > { %v2151_v54 = vpop.eup %2150  ;;  %v1031_v56 = vmul.f32 %v2149_v53, %v2619_v49 }
 0x23f   : > { %v1030_v57 = vmul.f32 %v2151_v54, %v2619_v49 }
 0x240   : > { %1060 = vadd.xlane.f32.xlu0 %v1031_v56 }
 0x241   : > { %1058 = vadd.xlane.f32.xlu1 %v1030_v57 }
 0x245   : > { %v2153_v58 = vpop.eup %2152 }
 0x246   : > { %v2155_v59 = vpop.eup %2154  ;;  %v1033_v61 = vmul.f32 %v2153_v58, %v2619_v49 }
 0x247   : > { %v1032_v62 = vmul.f32 %v2155_v59, %v2619_v49 }
 0x248   : > { %1064 = vadd.xlane.f32.xlu0 %v1033_v61 }
 0x249   : > { %1062 = vadd.xlane.f32.xlu1 %v1032_v62 }
 0x29d   : > { %v1037_v1 = vpop.xlane.xlu1 %1036 }
 0x29e   : > { %v1083_v2 = vmax.f32 %v1067_v63, %v1037_v1  ;;  %v1035_v3 = vpop.xlane.xlu0 %1034 }
 0x29f   : > { %v1082_v4 = vmax.f32 %v1066_v39, %v1035_v3 }
 0x2a0   : > { %v1099_v6 = vsub.f32 %v1067_v63, %v1083_v2  ;;  %v1147_v7 = vsub.f32 %v1037_v1, %v1083_v2  ;;  %1500 = vst.msk [vmem:[#allocation2 + $0x8] sm:$0xff] %vm1242_vm1, %v1083_v2  ;;  %v1073_v2 = vld [vmem:[#allocation2 + $0x38] sm:$0xff] }
 0x2a1   : > { %v1098_v9 = vsub.f32 %v1066_v39, %v1082_v4  ;;  %v1146_v10 = vsub.f32 %v1035_v3, %v1082_v4  ;;  %1499 = vst.msk [vmem:[#allocation2] sm:$0xff] %vm1242_vm1, %v1082_v4  ;;  %v1197_v3 = vld [vmem:[#allocation3 + $0x18] sm:$0xff] }
 0x2a2   : > { %v1116_v11 = vmul.f32 1.442695, %v1099_v6  ;;  %v1164_v12 = vmul.f32 1.442695, %v1147_v7  ;;  %v1072_v6 = vld [vmem:[#allocation2 + $0x30] sm:$0xff] }
 0x2a3   : > { %v1114_v49 = vmul.f32 1.442695, %v1098_v9  ;;  %v1162_v15 = vmul.f32 1.442695, %v1146_v10 }
 0x2a4   : > { %2156 = vpow2.f32 %v1116_v11 }
 0x2a5   : > { %2158 = vpow2.f32 %v1164_v12  ;;  %v1041_v16 = vpop.xlane.xlu0 %1040 }
 0x2a6   : > { %2160 = vpow2.f32 %v1114_v49  ;;  %v1085_v17 = vmax.f32 %v1069_v14, %v1041_v16 }
 0x2a7   : > { %2162 = vpow2.f32 %v1162_v15  ;;  %v1196_v15 = vld [vmem:[#allocation3 + $0x10] sm:$0xff] }
 0x2a8   : > { %v1101_v20 = vsub.f32 %v1069_v14, %v1085_v17  ;;  %v1149_v21 = vsub.f32 %v1041_v16, %v1085_v17  ;;  %1502 = vst.msk [vmem:[#allocation2 + $0x18] sm:$0xff] %vm1242_vm1, %v1085_v17 }
 0x2a9   : > { %v1039_v22 = vpop.xlane.xlu0 %1038 }
 0x2aa   : > { %v1120_v23 = vmul.f32 1.442695, %v1101_v20  ;;  %v1168_v26 = vmul.f32 1.442695, %v1149_v21  ;;  %v1084_v27 = vmax.f32 %v1068_v18, %v1039_v22 }
 0x2ac   : > { %2164 = vpow2.f32 %v1120_v23  ;;  %v1100_v32 = vsub.f32 %v1068_v18, %v1084_v27  ;;  %v1148_v33 = vsub.f32 %v1039_v22, %v1084_v27  ;;  %1501 = vst.msk [vmem:[#allocation2 + $0x10] sm:$0xff] %vm1242_vm1, %v1084_v27 }
 0x2ad   : > { %v1045_v35 = vpop.xlane.xlu0 %1044  ;;  %2166 = vpow2.f32 %v1168_v26 }
 0x2ae   : > { %v2157_v40 = vpop.eup %2156  ;;  %v1118_v42 = vmul.f32 1.442695, %v1100_v32  ;;  %v1166_v43 = vmul.f32 1.442695, %v1148_v33  ;;  %v1087_v46 = vmax.f32 %v1071_v28, %v1045_v35  ;;  %v1043_v47 = vpop.xlane.xlu1 %1042  ;;  %v1075_v32 = vld [vmem:[#allocation2 + $0x48] sm:$0xff] }
 0x2af   : > { %v2159_v31 = vpop.eup %2158  ;;  %v1211_v48 = vmul.f32 %v2157_v40, %v1195_v29  ;;  %v1086_v51 = vmax.f32 %v1070_v34, %v1043_v47  ;;  %1282 = vperm.xlu0 %2106, %v2157_v40   ;;  %v1199_v33 = vld [vmem:[#allocation3 + $0x28] sm:$0xff] }
 0x2b0   : > { %v2161_v52 = vpop.eup %2160  ;;  %2168 = vpow2.f32 %v1118_v42  ;;  %v1103_v53 = vsub.f32 %v1071_v28, %v1087_v46  ;;  %v1151_v54 = vsub.f32 %v1045_v35, %v1087_v46  ;;  %1504 = vst.msk [vmem:[#allocation2 + $0x28] sm:$0xff] %vm1242_vm1, %v1087_v46  ;;  %1378 = vperm.xlu1 %2107, %v2159_v31   ;;  %v1074_v35 = vld [vmem:[#allocation2 + $0x40] sm:$0xff] }
 0x2b1   : > { %v1227_v56 = vadd.f32 %v2159_v31, %v1211_v48  ;;  %v1210_v57 = vmul.f32 %v2161_v52, %v1194_v41  ;;  %2170 = vpow2.f32 %v1166_v43  ;;  %v1102_v58 = vsub.f32 %v1070_v34, %v1086_v51  ;;  %1503 = vst.msk [vmem:[#allocation2 + $0x20] sm:$0xff] %vm1242_vm1, %v1086_v51  ;;  %v2163_v59 = vpop.eup %2162  ;;  %v1198_v43 = vld [vmem:[#allocation3 + $0x20] sm:$0xff] }
 0x2b2   : > { %v1124_v61 = vmul.f32 1.442695, %v1103_v53  ;;  %v1172_v62 = vmul.f32 1.442695, %v1151_v54  ;;  %v1150_v63 = vsub.f32 %v1043_v47, %v1086_v51 }
 0x2b3   : > { %1244 = vst.msk [vmem:[#allocation3 + $0x8] sm:$0xff] %vm1242_vm1, %v1227_v56  ;;  %v1226_v39 = vadd.f32 %v2163_v59, %v1210_v57  ;;  %v1122_v1 = vmul.f32 1.442695, %v1102_v58  ;;  %1373 = vperm.xlu0 %2106, %v2163_v59  }
 0x2b4   : > { %2172 = vpow2.f32 %v1124_v61  ;;  %v1170_v4 = vmul.f32 1.442695, %v1150_v63  ;;  %1277 = vperm.xlu1 %2107, %v2161_v52  }
 0x2b5   : > { %1243 = vst.msk [vmem:[#allocation3] sm:$0xff] %vm1242_vm1, %v1226_v39  ;;  %2174 = vpow2.f32 %v1172_v62  ;;  %v1049_v7 = vpop.xlane.xlu0 %1048 }
 0x2b6   : > { %v2165_v9 = vpop.eup %2164  ;;  %2176 = vpow2.f32 %v1122_v1  ;;  %v1089_v10 = vmax.f32 %v1073_v2, %v1049_v7  ;;  %v1047_v11 = vpop.xlane.xlu1 %1046 }
 0x2b7   : > { %v1213_v12 = vmul.f32 %v2165_v9, %v1197_v3  ;;  %v1088_v49 = vmax.f32 %v1072_v6, %v1047_v11  ;;  %v2167_v14 = vpop.eup %2166  ;;  %2178 = vpow2.f32 %v1170_v4  ;;  %v1201_v3 = vld [vmem:[#allocation3 + $0x38] sm:$0xff] }
 0x2b8   : > { %v1105_v16 = vsub.f32 %v1073_v2, %v1089_v10  ;;  %v1153_v17 = vsub.f32 %v1049_v7, %v1089_v10  ;;  %1506 = vst.msk [vmem:[#allocation2 + $0x38] sm:$0xff] %vm1242_vm1, %v1089_v10  ;;  %1292 = vperm.xlu1 %2107, %v2165_v9   ;;  %v1077_v2 = vld [vmem:[#allocation2 + $0x58] sm:$0xff]  ;;  %v1200_v10 = vld [vmem:[#allocation3 + $0x30] sm:$0xff] }
 0x2b9   : > { %v1229_v18 = vadd.f32 %v2167_v14, %v1213_v12  ;;  %v1104_v20 = vsub.f32 %v1072_v6, %v1088_v49  ;;  %v1152_v21 = vsub.f32 %v1047_v11, %v1088_v49  ;;  %1505 = vst.msk [vmem:[#allocation2 + $0x30] sm:$0xff] %vm1242_vm1, %v1088_v49  ;;  %v1076_v6 = vld [vmem:[#allocation2 + $0x50] sm:$0xff] }
 0x2ba   : > { %v2169_v22 = vpop.eup %2168  ;;  %v1128_v23 = vmul.f32 1.442695, %v1105_v16  ;;  %v1176_v26 = vmul.f32 1.442695, %v1153_v17 }
 0x2bb   : > { %v2171_v27 = vpop.eup %2170  ;;  %1246 = vst.msk [vmem:[#allocation3 + $0x18] sm:$0xff] %vm1242_vm1, %v1229_v18  ;;  %v1212_v28 = vmul.f32 %v2169_v22, %v1196_v15  ;;  %v1126_v29 = vmul.f32 1.442695, %v1104_v20  ;;  %v1174_v34 = vmul.f32 1.442695, %v1152_v21 }
 0x2bc   : > { %2180 = vpow2.f32 %v1128_v23  ;;  %1388 = vperm.xlu1 %2107, %v2167_v14   ;;  %1383 = vperm.xlu0 %2106, %v2171_v27  }
 0x2bd   : > { %v1228_v40 = vadd.f32 %v2171_v27, %v1212_v28  ;;  %2182 = vpow2.f32 %v1176_v26  ;;  %v1053_v41 = vpop.xlane.xlu0 %1052 }
 0x2be   : > { %v2173_v42 = vpop.eup %2172  ;;  %2184 = vpow2.f32 %v1126_v29  ;;  %v1091_v46 = vmax.f32 %v1075_v32, %v1053_v41  ;;  %v1051_v47 = vpop.xlane.xlu1 %1050 }
 0x2bf   : > { %v2175_v31 = vpop.eup %2174  ;;  %1245 = vst.msk [vmem:[#allocation3 + $0x10] sm:$0xff] %vm1242_vm1, %v1228_v40  ;;  %v1215_v48 = vmul.f32 %v2173_v42, %v1199_v33  ;;  %v1090_v51 = vmax.f32 %v1074_v35, %v1051_v47  ;;  %2186 = vpow2.f32 %v1174_v34  ;;  %v1079_v33 = vld [vmem:[#allocation2 + $0x68] sm:$0xff]  ;;  %v1078_v40 = vld [vmem:[#allocation2 + $0x60] sm:$0xff] }
 0x2c0   : > { %v2177_v52 = vpop.eup %2176  ;;  %v1107_v53 = vsub.f32 %v1075_v32, %v1091_v46  ;;  %v1155_v54 = vsub.f32 %v1053_v41, %v1091_v46  ;;  %1508 = vst.msk [vmem:[#allocation2 + $0x48] sm:$0xff] %vm1242_vm1, %v1091_v46  ;;  %1287 = vperm.xlu1 %2107, %v2169_v22   ;;  %v1203_v34 = vld [vmem:[#allocation3 + $0x48] sm:$0xff] }
 0x2c1   : > { %v1231_v56 = vadd.f32 %v2175_v31, %v1215_v48  ;;  %v1214_v57 = vmul.f32 %v2177_v52, %v1198_v43  ;;  %v1106_v58 = vsub.f32 %v1074_v35, %v1090_v51  ;;  %v1154_v59 = vsub.f32 %v1051_v47, %v1090_v51  ;;  %1507 = vst.msk [vmem:[#allocation2 + $0x40] sm:$0xff] %vm1242_vm1, %v1090_v51  ;;  %v2179_v61 = vpop.eup %2178  ;;  %v1202_v43 = vld [vmem:[#allocation3 + $0x40] sm:$0xff] }
 0x2c2   : > { %1297 = vperm.xlu0 %2106, %v2177_v52   ;;  %v1132_v62 = vmul.f32 1.442695, %v1107_v53  ;;  %v1180_v63 = vmul.f32 1.442695, %v1155_v54 }
 0x2c3   : > { %1248 = vst.msk [vmem:[#allocation3 + $0x28] sm:$0xff] %vm1242_vm1, %v1231_v56  ;;  %v1230_v39 = vadd.f32 %v2179_v61, %v1214_v57  ;;  %v1130_v1 = vmul.f32 1.442695, %v1106_v58  ;;  %v1178_v4 = vmul.f32 1.442695, %v1154_v59 }
 0x2c4   : > { %2188 = vpow2.f32 %v1132_v62  ;;  %1302 = vperm.xlu1 %2107, %v2173_v42  }
 0x2c5   : > { %1247 = vst.msk [vmem:[#allocation3 + $0x20] sm:$0xff] %vm1242_vm1, %v1230_v39  ;;  %2190 = vpow2.f32 %v1180_v63  ;;  %v1057_v7 = vpop.xlane.xlu0 %1056 }
 0x2c6   : > { %1393 = vperm.xlu0 %2106, %v2179_v61   ;;  %v2181_v9 = vpop.eup %2180  ;;  %2192 = vpow2.f32 %v1130_v1  ;;  %v1093_v11 = vmax.f32 %v1077_v2, %v1057_v7  ;;  %v1055_v12 = vpop.xlane.xlu1 %1054 }
 0x2c7   : > { %v2183_v49 = vpop.eup %2182  ;;  %v1217_v14 = vmul.f32 %v2181_v9, %v1201_v3  ;;  %v1092_v15 = vmax.f32 %v1076_v6, %v1055_v12  ;;  %2194 = vpow2.f32 %v1178_v4  ;;  %v1205_v3 = vld [vmem:[#allocation3 + $0x58] sm:$0xff] }
 0x2c8   : > { %v2185_v16 = vpop.eup %2184  ;;  %v1109_v17 = vsub.f32 %v1077_v2, %v1093_v11  ;;  %v1157_v18 = vsub.f32 %v1057_v7, %v1093_v11  ;;  %1510 = vst.msk [vmem:[#allocation2 + $0x58] sm:$0xff] %vm1242_vm1, %v1093_v11  ;;  %1398 = vperm.xlu1 %2107, %v2175_v31   ;;  %v1081_v2 = vld [vmem:[#allocation2 + $0x78] sm:$0xff] }
 0x2c9   : > { %v1233_v20 = vadd.f32 %v2183_v49, %v1217_v14  ;;  %v1216_v21 = vmul.f32 %v2185_v16, %v1200_v10  ;;  %v1108_v22 = vsub.f32 %v1076_v6, %v1092_v15  ;;  %v1156_v23 = vsub.f32 %v1055_v12, %v1092_v15  ;;  %1509 = vst.msk [vmem:[#allocation2 + $0x50] sm:$0xff] %vm1242_vm1, %v1092_v15  ;;  %v2187_v26 = vpop.eup %2186  ;;  %v1080_v6 = vld [vmem:[#allocation2 + $0x70] sm:$0xff] }
 0x2ca   : > { %1307 = vperm.xlu0 %2106, %v2185_v16   ;;  %v1136_v27 = vmul.f32 1.442695, %v1109_v17  ;;  %v1184_v28 = vmul.f32 1.442695, %v1157_v18  ;;  %v1204_v10 = vld [vmem:[#allocation3 + $0x50] sm:$0xff] }
 0x2cb   : > { %1250 = vst.msk [vmem:[#allocation3 + $0x38] sm:$0xff] %vm1242_vm1, %v1233_v20  ;;  %v1232_v29 = vadd.f32 %v2187_v26, %v1216_v21  ;;  %v1134_v32 = vmul.f32 1.442695, %v1108_v22  ;;  %v1182_v35 = vmul.f32 1.442695, %v1156_v23 }
 0x2cc   : > { %2196 = vpow2.f32 %v1136_v27  ;;  %1312 = vperm.xlu1 %2107, %v2181_v9  }
 0x2cd   : > { %1249 = vst.msk [vmem:[#allocation3 + $0x30] sm:$0xff] %vm1242_vm1, %v1232_v29  ;;  %2198 = vpow2.f32 %v1184_v28  ;;  %v1061_v41 = vpop.xlane.xlu0 %1060 }
 0x2ce   : > { %1403 = vperm.xlu0 %2106, %v2187_v26   ;;  %v2189_v42 = vpop.eup %2188  ;;  %2200 = vpow2.f32 %v1134_v32  ;;  %v1095_v46 = vmax.f32 %v1079_v33, %v1061_v41  ;;  %v1059_v47 = vpop.xlane.xlu1 %1058 }
 0x2cf   : > { %v2191_v31 = vpop.eup %2190  ;;  %v1219_v48 = vmul.f32 %v2189_v42, %v1203_v34  ;;  %v1094_v51 = vmax.f32 %v1078_v40, %v1059_v47  ;;  %2202 = vpow2.f32 %v1182_v35 }
 0x2d0   : > { %v2193_v52 = vpop.eup %2192  ;;  %v1111_v53 = vsub.f32 %v1079_v33, %v1095_v46  ;;  %v1159_v54 = vsub.f32 %v1061_v41, %v1095_v46  ;;  %1512 = vst.msk [vmem:[#allocation2 + $0x68] sm:$0xff] %vm1242_vm1, %v1095_v46  ;;  %1408 = vperm.xlu1 %2107, %v2183_v49   ;;  %v1207_v33 = vld [vmem:[#allocation3 + $0x68] sm:$0xff] }
 0x2d1   : > { %v1235_v56 = vadd.f32 %v2191_v31, %v1219_v48  ;;  %v1218_v57 = vmul.f32 %v2193_v52, %v1202_v43  ;;  %v1110_v58 = vsub.f32 %v1078_v40, %v1094_v51  ;;  %v1158_v59 = vsub.f32 %v1059_v47, %v1094_v51  ;;  %1511 = vst.msk [vmem:[#allocation2 + $0x60] sm:$0xff] %vm1242_vm1, %v1094_v51  ;;  %v2195_v61 = vpop.eup %2194  ;;  %v1206_v40 = vld [vmem:[#allocation3 + $0x60] sm:$0xff]  ;;  %v1209_v51 = vld [vmem:[#allocation3 + $0x78] sm:$0xff] }
 0x2d2   : > { %1317 = vperm.xlu0 %2106, %v2193_v52   ;;  %v1140_v62 = vmul.f32 1.442695, %v1111_v53  ;;  %v1188_v63 = vmul.f32 1.442695, %v1159_v54  ;;  %v1208_v53 = vld [vmem:[#allocation3 + $0x70] sm:$0xff] }
 0x2d3   : > { %1252 = vst.msk [vmem:[#allocation3 + $0x48] sm:$0xff] %vm1242_vm1, %v1235_v56  ;;  %v1234_v39 = vadd.f32 %v2195_v61, %v1218_v57  ;;  %v1138_v1 = vmul.f32 1.442695, %v1110_v58  ;;  %v1186_v4 = vmul.f32 1.442695, %v1158_v59 }
 0x2d4   : > { %2204 = vpow2.f32 %v1140_v62  ;;  %1322 = vperm.xlu1 %2107, %v2189_v42  }
 0x2d5   : > { %1251 = vst.msk [vmem:[#allocation3 + $0x40] sm:$0xff] %vm1242_vm1, %v1234_v39  ;;  %2206 = vpow2.f32 %v1188_v63  ;;  %v1065_v7 = vpop.xlane.xlu0 %1064  ;;  %v1260_v63 = vld [vmem:[#allocation4 + $0x8] sm:$0xff] }
 0x2d6   : > { %1413 = vperm.xlu0 %2106, %v2195_v61   ;;  %v2197_v9 = vpop.eup %2196  ;;  %2208 = vpow2.f32 %v1138_v1  ;;  %v1097_v11 = vmax.f32 %v1081_v2, %v1065_v7  ;;  %v1063_v12 = vpop.xlane.xlu1 %1062 }
 0x2d7   : > { %v2199_v49 = vpop.eup %2198  ;;  %v1221_v14 = vmul.f32 %v2197_v9, %v1205_v3  ;;  %v1096_v15 = vmax.f32 %v1080_v6, %v1063_v12  ;;  %2210 = vpow2.f32 %v1186_v4  ;;  %v1259_v4 = vld [vmem:[#allocation4] sm:$0xff] }
 0x2d8   : > { %v2201_v16 = vpop.eup %2200  ;;  %v1113_v17 = vsub.f32 %v1081_v2, %v1097_v11  ;;  %v1161_v18 = vsub.f32 %v1065_v7, %v1097_v11  ;;  %1514 = vst.msk [vmem:[#allocation2 + $0x78] sm:$0xff] %vm1242_vm1, %v1097_v11  ;;  %1418 = vperm.xlu1 %2107, %v2191_v31  }
 0x2d9   : > { %v1237_v20 = vadd.f32 %v2199_v49, %v1221_v14  ;;  %v1220_v21 = vmul.f32 %v2201_v16, %v1204_v10  ;;  %v1112_v22 = vsub.f32 %v1080_v6, %v1096_v15  ;;  %v1160_v23 = vsub.f32 %v1063_v12, %v1096_v15  ;;  %1513 = vst.msk [vmem:[#allocation2 + $0x70] sm:$0xff] %vm1242_vm1, %v1096_v15  ;;  %v2203_v26 = vpop.eup %2202  ;;  %v1262_v14 = vld [vmem:[#allocation4 + $0x18] sm:$0xff] }
 0x2da   : > { %1327 = vperm.xlu0 %2106, %v2201_v16   ;;  %v1144_v27 = vmul.f32 1.442695, %v1113_v17  ;;  %v1192_v28 = vmul.f32 1.442695, %v1161_v18 }
 0x2db   : > { %1254 = vst.msk [vmem:[#allocation3 + $0x58] sm:$0xff] %vm1242_vm1, %v1237_v20  ;;  %v1236_v29 = vadd.f32 %v2203_v26, %v1220_v21  ;;  %v1142_v32 = vmul.f32 1.442695, %v1112_v22  ;;  %v1190_v34 = vmul.f32 1.442695, %v1160_v23  ;;  %v1261_v20 = vld [vmem:[#allocation4 + $0x10] sm:$0xff] }
 0x2dc   : > { %2212 = vpow2.f32 %v1144_v27  ;;  %1332 = vperm.xlu1 %2107, %v2197_v9   ;;  %v1263_v27 = vld [vmem:[#allocation4 + $0x20] sm:$0xff] }
 0x2dd   : > { %1253 = vst.msk [vmem:[#allocation3 + $0x50] sm:$0xff] %vm1242_vm1, %v1236_v29  ;;  %2214 = vpow2.f32 %v1192_v28 }
 0x2de   : > { %1423 = vperm.xlu0 %2106, %v2203_v26   ;;  %v2205_v35 = vpop.eup %2204  ;;  %2216 = vpow2.f32 %v1142_v32 }
 0x2df   : > { %v2207_v41 = vpop.eup %2206  ;;  %v1223_v42 = vmul.f32 %v2205_v35, %v1207_v33  ;;  %2218 = vpow2.f32 %v1190_v34  ;;  %v1264_v33 = vld [vmem:[#allocation4 + $0x28] sm:$0xff] }
 0x2e0   : > { %v2209_v43 = vpop.eup %2208  ;;  %1428 = vperm.xlu1 %2107, %v2199_v49  }
 0x2e1   : > { %v1239_v46 = vadd.f32 %v2207_v41, %v1223_v42  ;;  %v1222_v47 = vmul.f32 %v2209_v43, %v1206_v40  ;;  %v2211_v31 = vpop.eup %2210 }
 0x2e2   : > { %1337 = vperm.xlu0 %2106, %v2209_v43  }
 0x2e3   : > { %1256 = vst.msk [vmem:[#allocation3 + $0x68] sm:$0xff] %vm1242_vm1, %v1239_v46  ;;  %v1238_v48 = vadd.f32 %v2211_v31, %v1222_v47 }
 0x2e4   : > { %1342 = vperm.xlu1 %2107, %v2205_v35  }
 0x2e5   : > { %1255 = vst.msk [vmem:[#allocation3 + $0x60] sm:$0xff] %vm1242_vm1, %v1238_v48  ;;  %v1266_v48 = vld [vmem:[#allocation4 + $0x38] sm:$0xff] }
 0x2e6   : > { %1433 = vperm.xlu0 %2106, %v2211_v31   ;;  %v2213_v52 = vpop.eup %2212 }
 0x2e7   : > { %v2215_v54 = vpop.eup %2214  ;;  %v1225_v56 = vmul.f32 %v2213_v52, %v1209_v51 }
 0x2e8   : > { %v2217_v57 = vpop.eup %2216  ;;  %1438 = vperm.xlu1 %2107, %v2207_v41  }
 0x2e9   : > { %v1241_v58 = vadd.f32 %v2215_v54, %v1225_v56  ;;  %v1224_v59 = vmul.f32 %v2217_v57, %v1208_v53  ;;  %v2219_v61 = vpop.eup %2218 }
 0x2ea   : > { %1347 = vperm.xlu0 %2106, %v2217_v57  }
 0x2eb   : > { %1258 = vst.msk [vmem:[#allocation3 + $0x78] sm:$0xff] %vm1242_vm1, %v1241_v58  ;;  %v1240_v62 = vadd.f32 %v2219_v61, %v1224_v59 }
 0x2ec   : > { %1352 = vperm.xlu1 %2107, %v2213_v52  }
 0x2ed   : > { %1257 = vst.msk [vmem:[#allocation3 + $0x70] sm:$0xff] %vm1242_vm1, %v1240_v62  ;;  %v1268_v62 = vld [vmem:[#allocation4 + $0x48] sm:$0xff] }
 0x2ee   : > { %1443 = vperm.xlu0 %2106, %v2219_v61  }
 0x2f0   : > { %1448 = vperm.xlu1 %2107, %v2215_v54  }
 0x32e   : > { %v1283_v39 = vpop.permute.xlu0 %1282 }
 0x32f   : > { %v1379_v1 = vpop.permute.xlu1 %1378  ;;  %v1356_v2 = vmul.f32 %v1283_v39, %v1260_v63 }
 0x330   : > { %v1452_v3 = vmul.f32 %v1379_v1, %v2542_v44 }
 0x332   : > { %v1468_v6 = vadd.f32 %v1452_v3, %v1356_v2  ;;  %v1374_v7 = vpop.permute.xlu0 %1373 }
 0x333   : > { %v1278_v9 = vpop.permute.xlu1 %1277  ;;  %v1451_v10 = vmul.f32 %v1374_v7, %v2538_v38 }
 0x334   : > { %1484 = vst [vmem:[#allocation4 + $0x8] sm:$0xff] %v1468_v6  ;;  %v1355_v11 = vmul.f32 %v1278_v9, %v1259_v4 }
 0x336   : > { %v1467_v12 = vadd.f32 %v1451_v10, %v1355_v11  ;;  %v1270_v10 = vld [vmem:[#allocation4 + $0x58] sm:$0xff] }
 0x337   : > { %v1293_v49 = vpop.permute.xlu1 %1292 }
 0x338   : > { %1483 = vst [vmem:[#allocation4] sm:$0xff] %v1467_v12  ;;  %v1358_v17 = vmul.f32 %v1293_v49, %v1262_v14 }
 0x33b   : > { %v1389_v15 = vpop.permute.xlu1 %1388  ;;  %v1384_v16 = vpop.permute.xlu0 %1383 }
 0x33c   : > { %v1454_v18 = vmul.f32 %v1389_v15, %v2551_v60  ;;  %v1453_v22 = vmul.f32 %v1384_v16, %v2547_v55  ;;  %v1265_v55 = vld [vmem:[#allocation4 + $0x30] sm:$0xff] }
 0x33e   : > { %v1470_v21 = vadd.f32 %v1454_v18, %v1358_v17 }
 0x33f   : > { %v1288_v44 = vpop.permute.xlu1 %1287 }
 0x340   : > { %1486 = vst [vmem:[#allocation4 + $0x18] sm:$0xff] %v1470_v21  ;;  %v1357_v23 = vmul.f32 %v1288_v44, %v1261_v20  ;;  %v1272_v21 = vld [vmem:[#allocation4 + $0x68] sm:$0xff] }
 0x341   : > { %v1298_v26 = vpop.permute.xlu0 %1297 }
 0x342   : > { %v1469_v38 = vadd.f32 %v1453_v22, %v1357_v23  ;;  %v1359_v32 = vmul.f32 %v1298_v26, %v1263_v27 }
 0x343   : > { %v1303_v28 = vpop.permute.xlu1 %1302 }
 0x344   : > { %1485 = vst [vmem:[#allocation4 + $0x10] sm:$0xff] %v1469_v38  ;;  %v1360_v60 = vmul.f32 %v1303_v28, %v1264_v33  ;;  %v1274_v33 = vld [vmem:[#allocation4 + $0x78] sm:$0xff] }
 0x345   : > { %v1394_v29 = vpop.permute.xlu0 %1393 }
 0x346   : > { %v1455_v34 = vmul.f32 %v1394_v29, %v2556_v8 }
 0x347   : > { %v1399_v40 = vpop.permute.xlu1 %1398 }
 0x348   : > { %v1471_v35 = vadd.f32 %v1455_v34, %v1359_v32  ;;  %v1456_v41 = vmul.f32 %v1399_v40, %v2560_v13  ;;  %v1267_v13 = vld [vmem:[#allocation4 + $0x40] sm:$0xff] }
 0x349   : > { %v1308_v42 = vpop.permute.xlu0 %1307 }
 0x34a   : > { %1487 = vst [vmem:[#allocation4 + $0x20] sm:$0xff] %v1471_v35  ;;  %v1472_v43 = vadd.f32 %v1456_v41, %v1360_v60  ;;  %v1361_v31 = vmul.f32 %v1308_v42, %v1265_v55  ;;  %v1535_v42 = vld [vmem:[#allocation3] sm:$0xff] (!%p1835_p9)  ;;  %v2297_v55 = vmov (!%p1835_p9), 0  }
 0x34b   : > { %v1313_v46 = vpop.permute.xlu1 %1312  ;;  %2221 = vset.pattern.permute.xlu1 (!%p1835_p9), %v2297_v55  ;;  %2220 = vset.pattern.permute.xlu0 (!%p1835_p9), %v2297_v55 }
 0x34c   : > { %1488 = vst [vmem:[#allocation4 + $0x28] sm:$0xff] %v1472_v43  ;;  %v1362_v54 = vmul.f32 %v1313_v46, %v1266_v48  ;;  %v1538_v43 = vld [vmem:[#allocation3 + $0x18] sm:$0xff] (!%p1835_p9)  ;;  %v1536_v46 = vld [vmem:[#allocation3 + $0x8] sm:$0xff] (!%p1835_p9) }
 0x34d   : > { %v1404_v47 = vpop.permute.xlu0 %1403 }
 0x34e   : > { %v1457_v51 = vmul.f32 %v1404_v47, %v2565_v25  ;;  %v1539_v47 = vld [vmem:[#allocation3 + $0x20] sm:$0xff] (!%p1835_p9) }
 0x34f   : > { %v1409_v53 = vpop.permute.xlu1 %1408 }
 0x350   : > { %v1473_v52 = vadd.f32 %v1457_v51, %v1361_v31  ;;  %v1458_v8 = vmul.f32 %v1409_v53, %v2569_v30  ;;  %v1269_v30 = vld [vmem:[#allocation4 + $0x50] sm:$0xff] }
 0x351   : > { %v1318_v56 = vpop.permute.xlu0 %1317  ;;  %v1541_v31 = vld [vmem:[#allocation3 + $0x30] sm:$0xff] (!%p1835_p9) }
 0x352   : > { %1489 = vst [vmem:[#allocation4 + $0x30] sm:$0xff] %v1473_v52  ;;  %v1474_v57 = vadd.f32 %v1458_v8, %v1362_v54  ;;  %v1363_v61 = vmul.f32 %v1318_v56, %v1267_v13  ;;  %v1544_v52 = vld [vmem:[#allocation3 + $0x48] sm:$0xff] (!%p1835_p9)  ;;  %v1543_v54 = vld [vmem:[#allocation3 + $0x40] sm:$0xff] (!%p1835_p9)  ;;  %v1546_v56 = vld [vmem:[#allocation3 + $0x58] sm:$0xff] (!%p1835_p9) }
 0x353   : > { %v1323_v58 = vpop.permute.xlu1 %1322  ;;  %v1545_v13 = vld [vmem:[#allocation3 + $0x50] sm:$0xff] (!%p1835_p9) }
 0x354   : > { %1490 = vst [vmem:[#allocation4 + $0x38] sm:$0xff] %v1474_v57  ;;  %v1364_v2 = vmul.f32 %v1323_v58, %v1268_v62  ;;  %v1547_v62 = vld [vmem:[#allocation3 + $0x60] sm:$0xff] (!%p1835_p9) }
 0x355   : > { %v1414_v59 = vpop.permute.xlu0 %1413 }
 0x356   : > { %v1459_v63 = vmul.f32 %v1414_v59, %v2574_v45  ;;  %v1548_v59 = vld [vmem:[#allocation3 + $0x68] sm:$0xff] (!%p1835_p9) }
 0x357   : > { %v1419_v1 = vpop.permute.xlu1 %1418 }
 0x358   : > { %v1475_v39 = vadd.f32 %v1459_v63, %v1363_v61  ;;  %v1460_v25 = vmul.f32 %v1419_v1, %v2578_v50  ;;  %v1271_v50 = vld [vmem:[#allocation4 + $0x60] sm:$0xff] }
 0x359   : > { %v1328_v3 = vpop.permute.xlu0 %1327 }
 0x35a   : > { %1491 = vst [vmem:[#allocation4 + $0x40] sm:$0xff] %v1475_v39  ;;  %v1476_v4 = vadd.f32 %v1460_v25, %v1364_v2  ;;  %v1365_v9 = vmul.f32 %v1328_v3, %v1269_v30  ;;  %v1550_v39 = vld [vmem:[#allocation3 + $0x78] sm:$0xff] (!%p1835_p9)  ;;  %v1549_v2 = vld [vmem:[#allocation3 + $0x70] sm:$0xff] (!%p1835_p9) }
 0x35b   : > { %v1333_v6 = vpop.permute.xlu1 %1332 }
 0x35c   : > { %1492 = vst [vmem:[#allocation4 + $0x48] sm:$0xff] %v1476_v4  ;;  %v1366_v14 = vmul.f32 %v1333_v6, %v1270_v10  ;;  %v1521_v10 = vld [vmem:[#allocation4 + $0x10] sm:$0xff] (!%p1835_p9) }
 0x35d   : > { %v1424_v7 = vpop.permute.xlu0 %1423 }
 0x35e   : > { %v1461_v11 = vmul.f32 %v1424_v7, %v2583_v0 }
 0x35f   : > { %v1429_v49 = vpop.permute.xlu1 %1428 }
 0x360   : > { %v1477_v12 = vadd.f32 %v1461_v11, %v1365_v9  ;;  %v1462_v45 = vmul.f32 %v1429_v49, %v2587_v5  ;;  %v1273_v5 = vld [vmem:[#allocation4 + $0x70] sm:$0xff]  ;;  %v1519_v11 = vld [vmem:[#allocation4] sm:$0xff] (!%p1835_p9) }
 0x361   : > { %v1338_v15 = vpop.permute.xlu0 %1337 }
 0x362   : > { %1493 = vst [vmem:[#allocation4 + $0x50] sm:$0xff] %v1477_v12  ;;  %v1478_v16 = vadd.f32 %v1462_v45, %v1366_v14  ;;  %v1367_v20 = vmul.f32 %v1338_v15, %v1271_v50  ;;  %v1522_v15 = vld [vmem:[#allocation4 + $0x18] sm:$0xff] (!%p1835_p9) }
 0x363   : > { %v1343_v17 = vpop.permute.xlu1 %1342 }
 0x364   : > { %1494 = vst [vmem:[#allocation4 + $0x58] sm:$0xff] %v1478_v16  ;;  %v1368_v26 = vmul.f32 %v1343_v17, %v1272_v21  ;;  %v1520_v16 = vld [vmem:[#allocation4 + $0x8] sm:$0xff] (!%p1835_p9) }
 0x365   : > { %v1434_v18 = vpop.permute.xlu0 %1433  ;;  %v1524_v21 = vld [vmem:[#allocation4 + $0x28] sm:$0xff] (!%p1835_p9) }
 0x366   : > { %v1463_v44 = vmul.f32 %v1434_v18, %v2592_v19 }
 0x367   : > { %v1439_v23 = vpop.permute.xlu1 %1438 }
 0x368   : > { %v1479_v22 = vadd.f32 %v1463_v44, %v1367_v20  ;;  %v1464_v0 = vmul.f32 %v1439_v23, %v2596_v24  ;;  %v1537_v24 = vld [vmem:[#allocation3 + $0x10] sm:$0xff] (!%p1835_p9)  ;;  %v1523_v44 = vld [vmem:[#allocation4 + $0x20] sm:$0xff] (!%p1835_p9) }
 0x369   : > { %v1348_v38 = vpop.permute.xlu0 %1347  ;;  %2222 = vrcp.f32 (!%p1835_p9), %v1537_v24  ;;  %v1529_v24 = vld [vmem:[#allocation4 + $0x50] sm:$0xff] (!%p1835_p9) }
 0x36a   : > { %1495 = vst [vmem:[#allocation4 + $0x60] sm:$0xff] %v1479_v22  ;;  %v1480_v27 = vadd.f32 %v1464_v0, %v1368_v26  ;;  %v1369_v32 = vmul.f32 %v1348_v38, %v1273_v5  ;;  %2224 = vrcp.f32 (!%p1835_p9), %v1535_v42  ;;  %v1526_v38 = vld [vmem:[#allocation4 + $0x38] sm:$0xff] (!%p1835_p9) }
 0x36b   : > { %v1353_v28 = vpop.permute.xlu1 %1352  ;;  %2226 = vrcp.f32 (!%p1835_p9), %v1538_v43 }
 0x36c   : > { %1496 = vst [vmem:[#allocation4 + $0x68] sm:$0xff] %v1480_v27  ;;  %v1370_v60 = vmul.f32 %v1353_v28, %v1274_v33  ;;  %2228 = vrcp.f32 (!%p1835_p9), %v1536_v46  ;;  %v1525_v27 = vld [vmem:[#allocation4 + $0x30] sm:$0xff] (!%p1835_p9)  ;;  %v1528_v33 = vld [vmem:[#allocation4 + $0x48] sm:$0xff] (!%p1835_p9) }
 0x36d   : > { %v1444_v29 = vpop.permute.xlu0 %1443 }
 0x36e   : > { %v1465_v34 = vmul.f32 %v1444_v29, %v2600_v36  ;;  %1518 = sbr.rel (%p1835_p9) target bundleno = 1044 (0x414), region = 56  ;;  %v1540_v36 = vld [vmem:[#allocation3 + $0x28] sm:$0xff] (!%p1835_p9) }
 0x36f   : > { %v1449_v40 = vpop.permute.xlu1 %1448  ;;  %2230 = vrcp.f32 (!%p1835_p9), %v1540_v36 }
 0x370   : > { %v1481_v35 = vadd.f32 %v1465_v34, %v1369_v32  ;;  %v1466_v19 = vmul.f32 %v1449_v40, %v2604_v37  ;;  %2232 = vrcp.f32 (!%p1835_p9), %v1539_v47  ;;  %v1542_v37 = vld [vmem:[#allocation3 + $0x38] sm:$0xff] (!%p1835_p9)  ;;  %v1527_v34 = vld [vmem:[#allocation4 + $0x40] sm:$0xff] (!%p1835_p9) }
 0x371   : > { %2234 = vrcp.f32 (!%p1835_p9), %v1542_v37  ;;  %v1531_v47 = vld [vmem:[#allocation4 + $0x60] sm:$0xff] (!%p1835_p9) }
 0x372   : > { %1497 = vst [vmem:[#allocation4 + $0x70] sm:$0xff] %v1481_v35  ;;  %v1482_v41 = vadd.f32 %v1466_v19, %v1370_v60  ;;  %2236 = vrcp.f32 (!%p1835_p9), %v1541_v31 }
 0x373   : > { %v2223_v48 = vpop.eup (!%p1835_p9), %2222  ;;  %2238 = vrcp.f32 (!%p1835_p9), %v1544_v52  ;;  %v1532_v36 = vld [vmem:[#allocation4 + $0x68] sm:$0xff] (!%p1835_p9) }
 0x374   : > { %1498 = vst [vmem:[#allocation4 + $0x78] sm:$0xff] %v1482_v41  ;;  %v2225_v51 = vpop.eup (!%p1835_p9), %2224  ;;  %1595 = vperm.xlu1 (!%p1835_p9), %2221, %v2223_v48   ;;  %2240 = vrcp.f32 (!%p1835_p9), %v1543_v54  ;;  %v1530_v41 = vld [vmem:[#allocation4 + $0x58] sm:$0xff] (!%p1835_p9) }
 0x375   : > { %v2227_v53 = vpop.eup %2226  ;;  %1585 = vperm.xlu0 %2220, %v2225_v51   ;;  %2242 = vrcp.f32 %v1546_v56 }
 0x376   : > { %v2229_v8 = vpop.eup %2228  ;;  %2244 = vrcp.f32 %v1545_v13 }
 0x377   : > { %2246 = vrcp.f32 %v1548_v59 }
 0x378   : > { %1600 = vperm.xlu1 %2221, %v2227_v53   ;;  %2248 = vrcp.f32 %v1547_v62 }
 0x379   : > { %v2231_v57 = vpop.eup %2230  ;;  %1590 = vperm.xlu0 %2220, %v2229_v8   ;;  %2250 = vrcp.f32 %v1550_v39  ;;  %v1533_v53 = vld [vmem:[#allocation4 + $0x70] sm:$0xff] }
 0x37a   : > { %v2233_v58 = vpop.eup %2232  ;;  %2252 = vrcp.f32 %v1549_v2 }
 0x37b   : > { %v2235_v61 = vpop.eup %2234  ;;  %v1534_v52 = vld [vmem:[#allocation4 + $0x78] sm:$0xff] }
 0x37c   : > { %1610 = vperm.xlu1 %2221, %v2231_v57   ;;  %v2237_v63 = vpop.eup %2236 }
 0x37d   : > { %1605 = vperm.xlu0 %2220, %v2233_v58   ;;  %v2239_v1 = vpop.eup %2238 }
 0x37e   : > { %v2241_v25 = vpop.eup %2240 }
 0x37f   : > { %v2243_v3 = vpop.eup %2242 }
 0x380   : > { %1620 = vperm.xlu1 %2221, %v2235_v61   ;;  %v2245_v4 = vpop.eup %2244 }
 0x381   : > { %1615 = vperm.xlu0 %2220, %v2237_v63   ;;  %v2247_v30 = vpop.eup %2246 }
 0x382   : > { %v2249_v6 = vpop.eup %2248 }
 0x383   : > { %v2251_v7 = vpop.eup %2250 }
 0x384   : > { %1630 = vperm.xlu1 %2221, %v2239_v1   ;;  %v2253_v9 = vpop.eup %2252 }
 0x385   : > { %1625 = vperm.xlu0 %2220, %v2241_v25  }
 0x388   : > { %1640 = vperm.xlu1 %2221, %v2243_v3  }
 0x389   : > { %1635 = vperm.xlu0 %2220, %v2245_v4  }
 0x38c   : > { %1650 = vperm.xlu1 %2221, %v2247_v30  }
 0x38d   : > { %1645 = vperm.xlu0 %2220, %v2249_v6  }
 0x390   : > { %1660 = vperm.xlu1 %2221, %v2251_v7  }
 0x391   : > { %1655 = vperm.xlu0 %2220, %v2253_v9  }
 0x3f3   : > { %v1596_v12 = vpop.permute.xlu1 %1595 }
 0x3f4   : > { %v1665_v49 = vmul.f32 %v1596_v12, %v1521_v10  ;;  %v1586_v14 = vpop.permute.xlu0 %1585 }
 0x3f5   : > { %v1663_v45 = vmul.f32 %v1586_v14, %v1519_v11 }
 0x3f6   : > { %1681 = vst [vmem:[%s2384_s30 + $0x10] sm:$0xff] %v1665_v49 }
 0x3f7   : > { %1679 = vst [vmem:[%s2384_s30] sm:$0xff] %v1663_v45  ;;  %v1601_v50 = vpop.permute.xlu1 %1600 }
 0x3f8   : > { %v1666_v17 = vmul.f32 %v1601_v50, %v1522_v15  ;;  %v1591_v18 = vpop.permute.xlu0 %1590 }
 0x3f9   : > { %v1664_v20 = vmul.f32 %v1591_v18, %v1520_v16 }
 0x3fa   : > { %1682 = vst [vmem:[%s2384_s30 + $0x18] sm:$0xff] %v1666_v17 }
 0x3fb   : > { %1680 = vst [vmem:[%s2384_s30 + $0x8] sm:$0xff] %v1664_v20  ;;  %v1611_v22 = vpop.permute.xlu1 %1610 }
 0x3fc   : > { %v1668_v23 = vmul.f32 %v1611_v22, %v1524_v21  ;;  %v1606_v26 = vpop.permute.xlu0 %1605 }
 0x3fd   : > { %v1667_v0 = vmul.f32 %v1606_v26, %v1523_v44 }
 0x3fe   : > { %1684 = vst [vmem:[%s2384_s30 + $0x28] sm:$0xff] %v1668_v23 }
 0x3ff   : > { %1683 = vst [vmem:[%s2384_s30 + $0x20] sm:$0xff] %v1667_v0  ;;  %v1621_v5 = vpop.permute.xlu1 %1620 }
 0x400   : > { %v1670_v28 = vmul.f32 %v1621_v5, %v1526_v38  ;;  %v1616_v29 = vpop.permute.xlu0 %1615 }
 0x401   : > { %v1669_v32 = vmul.f32 %v1616_v29, %v1525_v27 }
 0x402   : > { %1686 = vst [vmem:[%s2384_s30 + $0x38] sm:$0xff] %v1670_v28 }
 0x403   : > { %1685 = vst [vmem:[%s2384_s30 + $0x30] sm:$0xff] %v1669_v32  ;;  %v1631_v35 = vpop.permute.xlu1 %1630 }
 0x404   : > { %v1672_v40 = vmul.f32 %v1631_v35, %v1528_v33  ;;  %v1626_v60 = vpop.permute.xlu0 %1625 }
 0x405   : > { %v1671_v19 = vmul.f32 %v1626_v60, %v1527_v34 }
 0x406   : > { %1688 = vst [vmem:[%s2384_s30 + $0x48] sm:$0xff] %v1672_v40 }
 0x407   : > { %1687 = vst [vmem:[%s2384_s30 + $0x40] sm:$0xff] %v1671_v19  ;;  %v1641_v42 = vpop.permute.xlu1 %1640 }
 0x408   : > { %v1674_v43 = vmul.f32 %v1641_v42, %v1530_v41  ;;  %v1636_v55 = vpop.permute.xlu0 %1635 }
 0x409   : > { %v1673_v46 = vmul.f32 %v1636_v55, %v1529_v24 }
 0x40a   : > { %1690 = vst [vmem:[%s2384_s30 + $0x58] sm:$0xff] %v1674_v43 }
 0x40b   : > { %1689 = vst [vmem:[%s2384_s30 + $0x50] sm:$0xff] %v1673_v46  ;;  %v1651_v37 = vpop.permute.xlu1 %1650 }
 0x40c   : > { %v1676_v31 = vmul.f32 %v1651_v37, %v1532_v36  ;;  %v1646_v48 = vpop.permute.xlu0 %1645 }
 0x40d   : > { %v1675_v51 = vmul.f32 %v1646_v48, %v1531_v47 }
 0x40e   : > { %1692 = vst [vmem:[%s2384_s30 + $0x68] sm:$0xff] %v1676_v31 }
 0x40f   : > { %1691 = vst [vmem:[%s2384_s30 + $0x60] sm:$0xff] %v1675_v51  ;;  %v1661_v54 = vpop.permute.xlu1 %1660 }
 0x410   : > { %v1678_v8 = vmul.f32 %v1661_v54, %v1534_v52  ;;  %v1656_v56 = vpop.permute.xlu0 %1655 }
 0x411   : > { %v1677_v57 = vmul.f32 %v1656_v56, %v1533_v53 }
 0x412   : > { %1694 = vst [vmem:[%s2384_s30 + $0x78] sm:$0xff] %v1678_v8 }
 0x413   : > { %1693 = vst [vmem:[%s2384_s30 + $0x70] sm:$0xff] %v1677_v57 }
 0x414 PF: > { %s17_s28 = sadd.s32 1, %s2292_s28   ;;  %s2739_s9 = sld [smem:[#allocation5_spill]] }
 0x415   : > { %p14_p10 = scmp.ge.s32.totalorder %s17_s28, 8   ;;  %s2740_s10 = sld [smem:[#allocation6_spill]] }
 0x416   : > { %s2741_s24 = smov %s2284_s26  ;;  %s2742_s25 = smov %s2288_s27 }
 0x417   :  { %16 = sbr.rel (!%p14_p10) target bundleno = 3 (0x3), region = 92 }
 0x41a   : > { %s2743_s26 = smov %s2739_s9 }
 0x41b   : > { %s2744_s27 = smov %s2740_s10 }

</bundles_post_ra>
